<compile_context>
chip_gen: v7x
topology: tpu7x:2x2x1
jax: 0.10.0
libtpu: 0.0.40
codegen_flags: <defaults>
</compile_context>

<pallas_src>
import functools
import math

import jax
import jax.numpy as jnp
import numpy as np
from jax.experimental import pallas as pl
from jax.experimental.pallas import tpu as pltpu


# --------------------------------------------------------------------------
# Pallas kernel: one full MAB (Multihead Attention Block) per batch tile.
# --------------------------------------------------------------------------
def _layer_norm_padded(z, gamma, beta, d_real, eps=1e-5):
    """LayerNorm over the first d_real columns of a zero-padded (rows, Dp) slab.

    Columns [d_real:] of z are structurally zero and gamma/beta are zero there,
    so padded output columns stay exactly zero.
    """
    d_pad = z.shape[-1]
    inv_d = 1.0 / d_real
    mu = jnp.sum(z, axis=-1, keepdims=True) * inv_d
    zc = z - mu
    # padded columns contribute (0 - mu)^2 each to the raw sum -> subtract them
    var = (jnp.sum(zc * zc, axis=-1, keepdims=True)
           - (d_pad - d_real) * (mu * mu)) * inv_d
    return zc * jax.lax.rsqrt(var + eps) * gamma + beta


def mab_kernel(x_ref, y_ref, w_ref, b_ref, o_ref, *, num_heads, d_real, shared_q):
    """One MAB on a batch tile (all feature dims padded to Dp lanes).

    x_ref : (1, M, Dp) if shared_q else (bb, M, Dp)   query-side input / residual
    y_ref : (bb, N, Dp)                               key/value-side input
    w_ref : (5, Dp, Dp) bf16 [Wq_fused*scale, Wk_fused, Wv_fused, Wo, Wff]
    b_ref : (9, Dp)     f32  [bq_f*s, bk_f, bv_f, bo, bff, g1, beta1, g2, beta2]
    o_ref : (bb, M, Dp)
    """
    f32 = jnp.float32
    bf16 = jnp.bfloat16
    H = num_heads

    y = y_ref[...]                        # (bb, N, Dp) f32
    bb, N, Dp = y.shape
    dhp = Dp // H
    yb = y.reshape(bb * N, Dp).astype(bf16)

    w = w_ref[...]                        # (5, Dp, Dp) bf16
    b = b_ref[...]                        # (9, Dp)     f32

    if shared_q:
        x0 = x_ref[0]                     # (M, Dp) shared across the batch tile
        M = x0.shape[0]
        Rq = bb * M
        # project once on M rows, then ONE hoisted broadcast for the batch tile
        qp1 = jnp.dot(x0.astype(bf16), w[0], preferred_element_type=f32) + b[0:1]
        qp = jnp.broadcast_to(qp1[None], (bb, M, Dp)).reshape(Rq, Dp)
        x_res = jnp.broadcast_to(x0[None], (bb, M, Dp)).reshape(Rq, Dp)
    else:
        x = x_ref[...]                    # (bb, M, Dp)
        M = x.shape[1]
        Rq = bb * M
        x_res = x.reshape(Rq, Dp)
        qp = jnp.dot(x_res.astype(bf16), w[0], preferred_element_type=f32) + b[0:1]

    # Fused linear_{k,v} + MultiheadAttention in_proj on the full batch slab.
    kp = jnp.dot(yb, w[1], preferred_element_type=f32) + b[1:2]   # (bb*N, Dp)
    vp = jnp.dot(yb, w[2], preferred_element_type=f32) + b[2:3]   # (bb*N, Dp)

    # Attention: per-head, 3-D leading-batch einsums (the Mosaic-supported
    # dot_general form).  Heads live in lane-aligned dhp-wide chunks of the
    # padded width (padded sub-columns are zero, so they do not perturb the
    # scores or the values).
    oh_heads = []
    for h in range(H):
        lo = h * dhp
        qh = qp[:, lo:lo + dhp].reshape(bb, M, dhp).astype(bf16)
        kh = kp[:, lo:lo + dhp].reshape(bb, N, dhp).astype(bf16)
        vh = vp[:, lo:lo + dhp].reshape(bb, N, dhp).astype(bf16)

        s = jnp.einsum('bmd,bnd->bmn', qh, kh, preferred_element_type=f32)
        s = s - jnp.max(s, axis=-1, keepdims=True)
        p = jnp.exp(s)
        p = p * pl.reciprocal(jnp.sum(p, axis=-1, keepdims=True), approx=True)
        oh = jnp.einsum('bmn,bnd->bmd', p.astype(bf16), vh,
                        preferred_element_type=f32)               # (bb, M, dhp)
        oh_heads.append(oh)

    # Concatenate heads along lanes -> ONE (Rq, Dp) x (Dp, Dp) out-projection
    # (replaces H tiny K=dh matmuls + accumulate adds).
    oh_full = jnp.concatenate(oh_heads, axis=-1).reshape(Rq, Dp).astype(bf16)
    att = jnp.dot(oh_full, w[3], preferred_element_type=f32) + b[3:4]   # (Rq, Dp)

    # residual + LayerNorm, feed-forward (Linear + ReLU), residual + LayerNorm
    h1 = _layer_norm_padded(x_res + att, b[5:6], b[6:7], d_real)
    ff = jnp.maximum(
        jnp.dot(h1.astype(bf16), w[4], preferred_element_type=f32) + b[4:5], 0.0)
    out = _layer_norm_padded(h1 + ff, b[7:8], b[8:9], d_real)

    # (Rq, Dp) -> (bb, M, Dp): a free leading-dim split on a lane-dense slab.
    o_ref[...] = out.reshape(bb, M, Dp).astype(o_ref.dtype)


def _pick_batch_block(B, rows_per_batch, target_rows=512):
    """Grid must have >= 2 parallel steps (v7x megacore) while growing the
    per-step slab toward ~512 rows (v6e HBM-roofline sweet spot)."""
    if B <= 1:
        return B
    target = max(1, target_rows // max(1, rows_per_batch))
    bb = max(1, min(B // 2, target))
    while B % bb:
        bb -= 1
    return bb


def mab_forward(x, y, p, num_heads, *, d_real, shared_q=False, batch_block=None):
    """x: (1|B, M, Dp) queries-side, y: (B, N, Dp) keys/values-side -> (B, M, Dp)."""
    B, N, Dp = y.shape
    M = x.shape[1]
    H = num_heads
    assert Dp % H == 0

    bb = batch_block if batch_block is not None else _pick_batch_block(B, max(M, N))
    assert B % bb == 0, "batch must be divisible by batch_block"
    grid = (B // bb,)

    if shared_q:
        # Same (1, M, Dp) block for every batch tile -> Pallas skips re-fetch.
        x_spec = pl.BlockSpec((1, M, Dp), lambda i: (0, 0, 0))
    else:
        x_spec = pl.BlockSpec((bb, M, Dp), lambda i: (i, 0, 0))

    in_specs = [
        x_spec,
        pl.BlockSpec((bb, N, Dp), lambda i: (i, 0, 0)),
        pl.BlockSpec((5, Dp, Dp), lambda i: (0, 0, 0)),
        pl.BlockSpec((9, Dp), lambda i: (0, 0)),
    ]

    return pl.pallas_call(
        functools.partial(mab_kernel, num_heads=H, d_real=d_real, shared_q=shared_q),
        out_shape=jax.ShapeDtypeStruct((B, M, Dp), x.dtype),
        grid=grid,
        in_specs=in_specs,
        out_specs=pl.BlockSpec((bb, M, Dp), lambda i: (i, 0, 0)),
        compiler_params=pltpu.CompilerParams(
            dimension_semantics=("parallel",),
            # explicit budget: well under v7x's 64 MiB physical VMEM, above the
            # 32 MiB scoped default so larger batch tiles also fit on v5e/v6e.
            vmem_limit_bytes=48 * 1024 * 1024),
    )(x, y, p["w"], p["b"])


def isab_forward(x, params, num_heads, *, batch_block=None):
    """x: (B, N, D) raw (unpadded) input -> (B, N, D)."""
    D = x.shape[-1]
    Dp = params["mab1"]["w"].shape[-1]
    xp = jnp.pad(x, ((0, 0), (0, 0), (0, Dp - D)))            # lane-dense, zeros
    h = mab_forward(params["inducing"], xp, params["mab1"], num_heads,
                    d_real=D, shared_q=True, batch_block=batch_block)   # (B, M, Dp)
    out = mab_forward(xp, h, params["mab2"], num_heads,
                      d_real=D, shared_q=False, batch_block=batch_block)  # (B, N, Dp)
    return out[..., :D]


# --------------------------------------------------------------------------
# Host-side parameter packing: fuse linear_q/k/v with in_proj, fold the softmax
# scale, pad the feature width to Dp lanes with a per-head column re-layout.
# --------------------------------------------------------------------------
def _pad_head_cols(w, D, H, Dp):
    """(D, D) -> (Dp, Dp): head h's dh output columns go to [h*dhp, h*dhp+dh)."""
    dh, dhp = D // H, Dp // H
    out = jnp.zeros((Dp, Dp), w.dtype)
    for h in range(H):
        out = out.at[:D, h * dhp:h * dhp + dh].set(w[:, h * dh:(h + 1) * dh])
    return out


def _pad_head_rows(w, D, H, Dp):
    """out-proj (D, D) -> (Dp, Dp): head h's dh input rows go to [h*dhp, ...)."""
    dh, dhp = D // H, Dp // H
    out = jnp.zeros((Dp, Dp), w.dtype)
    for h in range(H):
        out = out.at[h * dhp:h * dhp + dh, :D].set(w[h * dh:(h + 1) * dh, :])
    return out


def _pad_head_vec(b, D, H, Dp):
    dh, dhp = D // H, Dp // H
    out = jnp.zeros((1, Dp), b.dtype)
    for h in range(H):
        out = out.at[:, h * dhp:h * dhp + dh].set(b[:, h * dh:(h + 1) * dh])
    return out


def _pad_plain(w, D, Dp):
    return jnp.zeros((Dp, Dp), w.dtype).at[:D, :D].set(w)


def _pad_vec(b, D, Dp):
    return jnp.zeros((1, Dp), b.dtype).at[:, :D].set(b)


def pack_mab_params(p, D, H, Dp):
    dh = D // H
    assert Dp % 128 == 0 and Dp % H == 0
    scale = 1.0 / math.sqrt(dh)
    win = p["win_t"]                                   # (D, 3D)
    wq_f = (p["wq_t"] @ win[:, 0:D]) * scale
    bq_f = (p["bq"] @ win[:, 0:D] + p["bin"][:, 0:D]) * scale
    wk_f = p["wk_t"] @ win[:, D:2 * D]
    bk_f = p["bk"] @ win[:, D:2 * D] + p["bin"][:, D:2 * D]
    wv_f = p["wv_t"] @ win[:, 2 * D:3 * D]
    bv_f = p["bv"] @ win[:, 2 * D:3 * D] + p["bin"][:, 2 * D:3 * D]

    w = jnp.stack([
        _pad_head_cols(wq_f, D, H, Dp),
        _pad_head_cols(wk_f, D, H, Dp),
        _pad_head_cols(wv_f, D, H, Dp),
        _pad_head_rows(p["wo_t"], D, H, Dp),
        _pad_plain(p["wf_t"], D, Dp),
    ], axis=0).astype(jnp.bfloat16)                    # (5, Dp, Dp)

    b = jnp.concatenate([
        _pad_head_vec(bq_f, D, H, Dp),
        _pad_head_vec(bk_f, D, H, Dp),
        _pad_head_vec(bv_f, D, H, Dp),
        _pad_vec(p["bo"], D, Dp),
        _pad_vec(p["bf"], D, Dp),
        _pad_vec(p["g1"], D, Dp),                      # gamma/beta zero-padded
        _pad_vec(p["b1"], D, Dp),                      #  -> padded LN output is 0
        _pad_vec(p["g2"], D, Dp),
        _pad_vec(p["b2"], D, Dp),
    ], axis=0).astype(jnp.float32)                     # (9, Dp)
    return {"w": w, "b": b}


# --------------------------------------------------------------------------
# Deterministic parameter init (shapes from the module __init__; synthetic)
# --------------------------------------------------------------------------
def init_mab_raw(key, D):
    ks = jax.random.split(key, 16)
    s = 0.1
    n = lambda k, shape: jax.random.normal(k, shape, jnp.float32) * s
    return {
        "wq_t": n(ks[0], (D, D)),       "bq": n(ks[1], (1, D)),
        "wk_t": n(ks[2], (D, D)),       "bk": n(ks[3], (1, D)),
        "wv_t": n(ks[4], (D, D)),       "bv": n(ks[5], (1, D)),
        "win_t": n(ks[6], (D, 3 * D)),  "bin": n(ks[7], (1, 3 * D)),
        "wo_t": n(ks[8], (D, D)),       "bo": n(ks[9], (1, D)),
        "wf_t": n(ks[10], (D, D)),      "bf": n(ks[11], (1, D)),
        "g1": 1.0 + n(ks[12], (1, D)),  "b1": n(ks[13], (1, D)),
        "g2": 1.0 + n(ks[14], (1, D)),  "b2": n(ks[15], (1, D)),
    }


# --------------------------------------------------------------------------
# Pure-JAX f32 reference (same math as PyTorch forward, unfused, unpadded)
# --------------------------------------------------------------------------
def mab_ref(x, y, p, H):
    B, M, D = x.shape
    N = y.shape[1]
    dh = D // H
    q = x @ p["wq_t"] + p["bq"]
    k = y @ p["wk_t"] + p["bk"]
    v = y @ p["wv_t"] + p["bv"]
    qp = q @ p["win_t"][:, :D] + p["bin"][:, :D]
    kp = k @ p["win_t"][:, D:2 * D] + p["bin"][:, D:2 * D]
    vp = v @ p["win_t"][:, 2 * D:] + p["bin"][:, 2 * D:]
    qh = qp.reshape(B, M, H, dh).transpose(0, 2, 1, 3) / math.sqrt(dh)
    kh = kp.reshape(B, N, H, dh).transpose(0, 2, 1, 3)
    vh = vp.reshape(B, N, H, dh).transpose(0, 2, 1, 3)
    a = jax.nn.softmax(qh @ kh.transpose(0, 1, 3, 2), axis=-1)
    o = (a @ vh).transpose(0, 2, 1, 3).reshape(B, M, D)
    att = o @ p["wo_t"] + p["bo"]

    def ln(z, g, b):
        mu = z.mean(-1, keepdims=True)
        var = ((z - mu) ** 2).mean(-1, keepdims=True)
        return (z - mu) / jnp.sqrt(var + 1e-5) * g + b

    h1 = ln(x + att, p["g1"], p["b1"])
    ff = jax.nn.relu(h1 @ p["wf_t"] + p["bf"])
    return ln(h1 + ff, p["g2"], p["b2"])


def isab_ref(x, raw, H):
    B = x.shape[0]
    i = jnp.tile(raw["inducing"], (B, 1, 1))
    h = mab_ref(i, x, raw["mab1"], H)
    return mab_ref(x, h, raw["mab2"], H)


if __name__ == "__main__":
    D = 32    # in_features == out_features (required by the module's shape algebra)
    H = 4     # num_heads
    M = 8     # inducing_points
    B, N = 2, 16
    Dp = max(128, ((D + 127) // 128) * 128)   # lane-dense padded feature width

    key = jax.random.PRNGKey(0)
    kx, k1, k2, ki = jax.random.split(key, 4)
    x = jax.random.normal(kx, (B, N, D), jnp.float32)

    raw = {
        "mab1": init_mab_raw(k1, D),
        "mab2": init_mab_raw(k2, D),
        # xavier-ish scale for the inducing points (module uses xavier_uniform_)
        "inducing": jax.random.normal(ki, (1, M, D), jnp.float32) * 0.25,
    }
    packed = {
        "mab1": pack_mab_params(raw["mab1"], D, H, Dp),
        "mab2": pack_mab_params(raw["mab2"], D, H, Dp),
        "inducing": jnp.pad(raw["inducing"], ((0, 0), (0, 0), (0, Dp - D))),
    }

    out = jax.block_until_ready(isab_forward(x, packed, H))
    assert out.shape == (B, N, D)

    ref = isab_ref(x, raw, H)
    # bf16 matmul operands + fused weights + approx softmax recip => loose tol
    np.testing.assert_allclose(np.asarray(out), np.asarray(ref), atol=5e-2, rtol=5e-2)
    print("KERNEL_OK")
</pallas_src>

<mosaic_0001>
module attributes {stable_mosaic.version = 11 : i64} {
  func.func @mab_kernel(%arg0: i32, %arg1: memref<1x8x128xf32, #tpu.memory_space<vmem>>, %arg2: memref<1x16x128xf32, #tpu.memory_space<vmem>>, %arg3: memref<5x128x128xbf16, #tpu.memory_space<vmem>>, %arg4: memref<9x128xf32, #tpu.memory_space<vmem>>, %arg5: memref<1x8x128xf32, #tpu.memory_space<vmem>>) attributes {dimension_semantics = [#tpu.dimension_semantics<parallel>], iteration_bounds = array<i64: 2>, scalar_prefetch = 0 : i64, scratch_operands = 0 : i64, tpu.core_type = #tpu.core_type<tc>, window_params = [{pipeline_mode = #tpu.pipeline_mode<synchronous>, transform_indices = @transform_0, window_bounds = array<i64: 1, 8, 128>}, {transform_indices = @transform_1, window_bounds = array<i64: 1, 16, 128>}, {pipeline_mode = #tpu.pipeline_mode<synchronous>, transform_indices = @transform_2, window_bounds = array<i64: 5, 128, 128>}, {pipeline_mode = #tpu.pipeline_mode<synchronous>, transform_indices = @transform_3, window_bounds = array<i64: 9, 128>}, {transform_indices = @transform_4, window_bounds = array<i64: 1, 8, 128>}]} {
    %c0 = arith.constant 0 : index
    %c0_0 = arith.constant 0 : index
    %c0_1 = arith.constant 0 : index
    %0 = vector.load %arg2[%c0, %c0_0, %c0_1] : memref<1x16x128xf32, #tpu.memory_space<vmem>>, vector<1x16x128xf32>
    %1 = vector.shape_cast %0 : vector<1x16x128xf32> to vector<16x128xf32>
    %2 = arith.truncf %1 : vector<16x128xf32> to vector<16x128xbf16>
    %c0_2 = arith.constant 0 : index
    %c0_3 = arith.constant 0 : index
    %c0_4 = arith.constant 0 : index
    %3 = vector.load %arg3[%c0_2, %c0_3, %c0_4] : memref<5x128x128xbf16, #tpu.memory_space<vmem>>, vector<5x128x128xbf16>
    %c0_5 = arith.constant 0 : index
    %c0_6 = arith.constant 0 : index
    %4 = vector.load %arg4[%c0_5, %c0_6] : memref<9x128xf32, #tpu.memory_space<vmem>>, vector<9x128xf32>
    %c0_7 = arith.constant 0 : index
    %c0_8 = arith.constant 0 : index
    %c0_9 = arith.constant 0 : index
    %5 = vector.load %arg1[%c0_7, %c0_8, %c0_9] : memref<1x8x128xf32, #tpu.memory_space<vmem>>, vector<1x8x128xf32>
    %6 = vector.shape_cast %5 : vector<1x8x128xf32> to vector<8x128xf32>
    %7 = arith.truncf %6 : vector<8x128xf32> to vector<8x128xbf16>
    %8 = vector.extract_strided_slice %3 {offsets = [0, 0, 0], sizes = [1, 128, 128], strides = [1, 1, 1]} : vector<5x128x128xbf16> to vector<1x128x128xbf16>
    %9 = vector.shape_cast %8 : vector<1x128x128xbf16> to vector<128x128xbf16>
    %cst = arith.constant dense<0.000000e+00> : vector<8x128xf32>
    %10 = tpu.matmul %7, %9, %cst {dimension_numbers = #tpu.dot_dimension_numbers<[1], [0], [0], [1], [0, 0, 1, 1], [], []>} : vector<8x128xbf16>, vector<128x128xbf16>, vector<8x128xf32> -> vector<8x128xf32>
    %11 = vector.extract_strided_slice %4 {offsets = [0, 0], sizes = [1, 128], strides = [1, 1]} : vector<9x128xf32> to vector<1x128xf32>
    %12 = vector.broadcast %11 : vector<1x128xf32> to vector<8x128xf32>
    %13 = arith.addf %10, %12 : vector<8x128xf32>
    %14 = vector.shape_cast %13 : vector<8x128xf32> to vector<1x8x128xf32>
    %15 = vector.shape_cast %14 : vector<1x8x128xf32> to vector<8x128xf32>
    %16 = vector.shape_cast %6 : vector<8x128xf32> to vector<1x8x128xf32>
    %17 = vector.shape_cast %16 : vector<1x8x128xf32> to vector<8x128xf32>
    %18 = vector.extract_strided_slice %3 {offsets = [1, 0, 0], sizes = [1, 128, 128], strides = [1, 1, 1]} : vector<5x128x128xbf16> to vector<1x128x128xbf16>
    %19 = vector.shape_cast %18 : vector<1x128x128xbf16> to vector<128x128xbf16>
    %cst_10 = arith.constant dense<0.000000e+00> : vector<16x128xf32>
    %20 = tpu.matmul %2, %19, %cst_10 {dimension_numbers = #tpu.dot_dimension_numbers<[1], [0], [0], [1], [0, 0, 1, 1], [], []>} : vector<16x128xbf16>, vector<128x128xbf16>, vector<16x128xf32> -> vector<16x128xf32>
    %21 = vector.extract_strided_slice %4 {offsets = [1, 0], sizes = [1, 128], strides = [1, 1]} : vector<9x128xf32> to vector<1x128xf32>
    %22 = vector.broadcast %21 : vector<1x128xf32> to vector<16x128xf32>
    %23 = arith.addf %20, %22 : vector<16x128xf32>
    %24 = vector.extract_strided_slice %3 {offsets = [2, 0, 0], sizes = [1, 128, 128], strides = [1, 1, 1]} : vector<5x128x128xbf16> to vector<1x128x128xbf16>
    %25 = vector.shape_cast %24 : vector<1x128x128xbf16> to vector<128x128xbf16>
    %cst_11 = arith.constant dense<0.000000e+00> : vector<16x128xf32>
    %26 = tpu.matmul %2, %25, %cst_11 {dimension_numbers = #tpu.dot_dimension_numbers<[1], [0], [0], [1], [0, 0, 1, 1], [], []>} : vector<16x128xbf16>, vector<128x128xbf16>, vector<16x128xf32> -> vector<16x128xf32>
    %27 = vector.extract_strided_slice %4 {offsets = [2, 0], sizes = [1, 128], strides = [1, 1]} : vector<9x128xf32> to vector<1x128xf32>
    %28 = vector.broadcast %27 : vector<1x128xf32> to vector<16x128xf32>
    %29 = arith.addf %26, %28 : vector<16x128xf32>
    %30 = vector.extract_strided_slice %15 {offsets = [0, 0], sizes = [8, 32], strides = [1, 1]} : vector<8x128xf32> to vector<8x32xf32>
    %31 = vector.shape_cast %30 : vector<8x32xf32> to vector<1x8x32xf32>
    %32 = arith.truncf %31 : vector<1x8x32xf32> to vector<1x8x32xbf16>
    %33 = vector.extract_strided_slice %23 {offsets = [0, 0], sizes = [16, 32], strides = [1, 1]} : vector<16x128xf32> to vector<16x32xf32>
    %34 = vector.shape_cast %33 : vector<16x32xf32> to vector<1x16x32xf32>
    %35 = arith.truncf %34 : vector<1x16x32xf32> to vector<1x16x32xbf16>
    %36 = vector.extract_strided_slice %29 {offsets = [0, 0], sizes = [16, 32], strides = [1, 1]} : vector<16x128xf32> to vector<16x32xf32>
    %37 = vector.shape_cast %36 : vector<16x32xf32> to vector<1x16x32xf32>
    %38 = arith.truncf %37 : vector<1x16x32xf32> to vector<1x16x32xbf16>
    "tpu.trace_start"() <{level = 10 : i32, message = "bmd,bnd->bmn"}> : () -> ()
    %cst_12 = arith.constant dense<0.000000e+00> : vector<1x8x16xf32>
    %39 = tpu.matmul %32, %35, %cst_12 {dimension_numbers = #tpu.dot_dimension_numbers<[2], [2], [1], [1], [0, 0, 0, 1, 1, 1], [0], [0]>} : vector<1x8x32xbf16>, vector<1x16x32xbf16>, vector<1x8x16xf32> -> vector<1x8x16xf32>
    "tpu.trace_stop"() : () -> ()
    %cst_13 = arith.constant dense<0xFF800000> : vector<1x8xf32>
    %40 = vector.multi_reduction <maximumf>, %39, %cst_13 [2] : vector<1x8x16xf32> to vector<1x8xf32>
    %41 = vector.shape_cast %40 : vector<1x8xf32> to vector<1x8x1xf32>
    %42 = vector.broadcast %41 : vector<1x8x1xf32> to vector<1x8x16xf32>
    %43 = arith.subf %39, %42 : vector<1x8x16xf32>
    %44 = math.exp %43 : vector<1x8x16xf32>
    %cst_14 = arith.constant dense<0.000000e+00> : vector<1x8xf32>
    %45 = vector.multi_reduction <add>, %44, %cst_14 [2] : vector<1x8x16xf32> to vector<1x8xf32>
    %46 = vector.shape_cast %45 : vector<1x8xf32> to vector<1x8x1xf32>
    %47 = tpu.reciprocal %46 {approx = true} : vector<1x8x1xf32> -> vector<1x8x1xf32>
    %48 = vector.broadcast %47 : vector<1x8x1xf32> to vector<1x8x16xf32>
    %49 = arith.mulf %44, %48 : vector<1x8x16xf32>
    %50 = arith.truncf %49 : vector<1x8x16xf32> to vector<1x8x16xbf16>
    "tpu.trace_start"() <{level = 10 : i32, message = "bmn,bnd->bmd"}> : () -> ()
    %cst_15 = arith.constant dense<0.000000e+00> : vector<1x8x32xf32>
    %51 = tpu.matmul %50, %38, %cst_15 {dimension_numbers = #tpu.dot_dimension_numbers<[2], [1], [1], [2], [0, 0, 0, 1, 1, 2], [0], [0]>} : vector<1x8x16xbf16>, vector<1x16x32xbf16>, vector<1x8x32xf32> -> vector<1x8x32xf32>
    "tpu.trace_stop"() : () -> ()
    %52 = vector.extract_strided_slice %15 {offsets = [0, 32], sizes = [8, 32], strides = [1, 1]} : vector<8x128xf32> to vector<8x32xf32>
    %53 = vector.shape_cast %52 : vector<8x32xf32> to vector<1x8x32xf32>
    %54 = arith.truncf %53 : vector<1x8x32xf32> to vector<1x8x32xbf16>
    %55 = vector.extract_strided_slice %23 {offsets = [0, 32], sizes = [16, 32], strides = [1, 1]} : vector<16x128xf32> to vector<16x32xf32>
    %56 = vector.shape_cast %55 : vector<16x32xf32> to vector<1x16x32xf32>
    %57 = arith.truncf %56 : vector<1x16x32xf32> to vector<1x16x32xbf16>
    %58 = vector.extract_strided_slice %29 {offsets = [0, 32], sizes = [16, 32], strides = [1, 1]} : vector<16x128xf32> to vector<16x32xf32>
    %59 = vector.shape_cast %58 : vector<16x32xf32> to vector<1x16x32xf32>
    %60 = arith.truncf %59 : vector<1x16x32xf32> to vector<1x16x32xbf16>
    "tpu.trace_start"() <{level = 10 : i32, message = "bmd,bnd->bmn"}> : () -> ()
    %cst_16 = arith.constant dense<0.000000e+00> : vector<1x8x16xf32>
    %61 = tpu.matmul %54, %57, %cst_16 {dimension_numbers = #tpu.dot_dimension_numbers<[2], [2], [1], [1], [0, 0, 0, 1, 1, 1], [0], [0]>} : vector<1x8x32xbf16>, vector<1x16x32xbf16>, vector<1x8x16xf32> -> vector<1x8x16xf32>
    "tpu.trace_stop"() : () -> ()
    %cst_17 = arith.constant dense<0xFF800000> : vector<1x8xf32>
    %62 = vector.multi_reduction <maximumf>, %61, %cst_17 [2] : vector<1x8x16xf32> to vector<1x8xf32>
    %63 = vector.shape_cast %62 : vector<1x8xf32> to vector<1x8x1xf32>
    %64 = vector.broadcast %63 : vector<1x8x1xf32> to vector<1x8x16xf32>
    %65 = arith.subf %61, %64 : vector<1x8x16xf32>
    %66 = math.exp %65 : vector<1x8x16xf32>
    %cst_18 = arith.constant dense<0.000000e+00> : vector<1x8xf32>
    %67 = vector.multi_reduction <add>, %66, %cst_18 [2] : vector<1x8x16xf32> to vector<1x8xf32>
    %68 = vector.shape_cast %67 : vector<1x8xf32> to vector<1x8x1xf32>
    %69 = tpu.reciprocal %68 {approx = true} : vector<1x8x1xf32> -> vector<1x8x1xf32>
    %70 = vector.broadcast %69 : vector<1x8x1xf32> to vector<1x8x16xf32>
    %71 = arith.mulf %66, %70 : vector<1x8x16xf32>
    %72 = arith.truncf %71 : vector<1x8x16xf32> to vector<1x8x16xbf16>
    "tpu.trace_start"() <{level = 10 : i32, message = "bmn,bnd->bmd"}> : () -> ()
    %cst_19 = arith.constant dense<0.000000e+00> : vector<1x8x32xf32>
    %73 = tpu.matmul %72, %60, %cst_19 {dimension_numbers = #tpu.dot_dimension_numbers<[2], [1], [1], [2], [0, 0, 0, 1, 1, 2], [0], [0]>} : vector<1x8x16xbf16>, vector<1x16x32xbf16>, vector<1x8x32xf32> -> vector<1x8x32xf32>
    "tpu.trace_stop"() : () -> ()
    %74 = vector.extract_strided_slice %15 {offsets = [0, 64], sizes = [8, 32], strides = [1, 1]} : vector<8x128xf32> to vector<8x32xf32>
    %75 = vector.shape_cast %74 : vector<8x32xf32> to vector<1x8x32xf32>
    %76 = arith.truncf %75 : vector<1x8x32xf32> to vector<1x8x32xbf16>
    %77 = vector.extract_strided_slice %23 {offsets = [0, 64], sizes = [16, 32], strides = [1, 1]} : vector<16x128xf32> to vector<16x32xf32>
    %78 = vector.shape_cast %77 : vector<16x32xf32> to vector<1x16x32xf32>
    %79 = arith.truncf %78 : vector<1x16x32xf32> to vector<1x16x32xbf16>
    %80 = vector.extract_strided_slice %29 {offsets = [0, 64], sizes = [16, 32], strides = [1, 1]} : vector<16x128xf32> to vector<16x32xf32>
    %81 = vector.shape_cast %80 : vector<16x32xf32> to vector<1x16x32xf32>
    %82 = arith.truncf %81 : vector<1x16x32xf32> to vector<1x16x32xbf16>
    "tpu.trace_start"() <{level = 10 : i32, message = "bmd,bnd->bmn"}> : () -> ()
    %cst_20 = arith.constant dense<0.000000e+00> : vector<1x8x16xf32>
    %83 = tpu.matmul %76, %79, %cst_20 {dimension_numbers = #tpu.dot_dimension_numbers<[2], [2], [1], [1], [0, 0, 0, 1, 1, 1], [0], [0]>} : vector<1x8x32xbf16>, vector<1x16x32xbf16>, vector<1x8x16xf32> -> vector<1x8x16xf32>
    "tpu.trace_stop"() : () -> ()
    %cst_21 = arith.constant dense<0xFF800000> : vector<1x8xf32>
    %84 = vector.multi_reduction <maximumf>, %83, %cst_21 [2] : vector<1x8x16xf32> to vector<1x8xf32>
    %85 = vector.shape_cast %84 : vector<1x8xf32> to vector<1x8x1xf32>
    %86 = vector.broadcast %85 : vector<1x8x1xf32> to vector<1x8x16xf32>
    %87 = arith.subf %83, %86 : vector<1x8x16xf32>
    %88 = math.exp %87 : vector<1x8x16xf32>
    %cst_22 = arith.constant dense<0.000000e+00> : vector<1x8xf32>
    %89 = vector.multi_reduction <add>, %88, %cst_22 [2] : vector<1x8x16xf32> to vector<1x8xf32>
    %90 = vector.shape_cast %89 : vector<1x8xf32> to vector<1x8x1xf32>
    %91 = tpu.reciprocal %90 {approx = true} : vector<1x8x1xf32> -> vector<1x8x1xf32>
    %92 = vector.broadcast %91 : vector<1x8x1xf32> to vector<1x8x16xf32>
    %93 = arith.mulf %88, %92 : vector<1x8x16xf32>
    %94 = arith.truncf %93 : vector<1x8x16xf32> to vector<1x8x16xbf16>
    "tpu.trace_start"() <{level = 10 : i32, message = "bmn,bnd->bmd"}> : () -> ()
    %cst_23 = arith.constant dense<0.000000e+00> : vector<1x8x32xf32>
    %95 = tpu.matmul %94, %82, %cst_23 {dimension_numbers = #tpu.dot_dimension_numbers<[2], [1], [1], [2], [0, 0, 0, 1, 1, 2], [0], [0]>} : vector<1x8x16xbf16>, vector<1x16x32xbf16>, vector<1x8x32xf32> -> vector<1x8x32xf32>
    "tpu.trace_stop"() : () -> ()
    %96 = vector.extract_strided_slice %15 {offsets = [0, 96], sizes = [8, 32], strides = [1, 1]} : vector<8x128xf32> to vector<8x32xf32>
    %97 = vector.shape_cast %96 : vector<8x32xf32> to vector<1x8x32xf32>
    %98 = arith.truncf %97 : vector<1x8x32xf32> to vector<1x8x32xbf16>
    %99 = vector.extract_strided_slice %23 {offsets = [0, 96], sizes = [16, 32], strides = [1, 1]} : vector<16x128xf32> to vector<16x32xf32>
    %100 = vector.shape_cast %99 : vector<16x32xf32> to vector<1x16x32xf32>
    %101 = arith.truncf %100 : vector<1x16x32xf32> to vector<1x16x32xbf16>
    %102 = vector.extract_strided_slice %29 {offsets = [0, 96], sizes = [16, 32], strides = [1, 1]} : vector<16x128xf32> to vector<16x32xf32>
    %103 = vector.shape_cast %102 : vector<16x32xf32> to vector<1x16x32xf32>
    %104 = arith.truncf %103 : vector<1x16x32xf32> to vector<1x16x32xbf16>
    "tpu.trace_start"() <{level = 10 : i32, message = "bmd,bnd->bmn"}> : () -> ()
    %cst_24 = arith.constant dense<0.000000e+00> : vector<1x8x16xf32>
    %105 = tpu.matmul %98, %101, %cst_24 {dimension_numbers = #tpu.dot_dimension_numbers<[2], [2], [1], [1], [0, 0, 0, 1, 1, 1], [0], [0]>} : vector<1x8x32xbf16>, vector<1x16x32xbf16>, vector<1x8x16xf32> -> vector<1x8x16xf32>
    "tpu.trace_stop"() : () -> ()
    %cst_25 = arith.constant dense<0xFF800000> : vector<1x8xf32>
    %106 = vector.multi_reduction <maximumf>, %105, %cst_25 [2] : vector<1x8x16xf32> to vector<1x8xf32>
    %107 = vector.shape_cast %106 : vector<1x8xf32> to vector<1x8x1xf32>
    %108 = vector.broadcast %107 : vector<1x8x1xf32> to vector<1x8x16xf32>
    %109 = arith.subf %105, %108 : vector<1x8x16xf32>
    %110 = math.exp %109 : vector<1x8x16xf32>
    %cst_26 = arith.constant dense<0.000000e+00> : vector<1x8xf32>
    %111 = vector.multi_reduction <add>, %110, %cst_26 [2] : vector<1x8x16xf32> to vector<1x8xf32>
    %112 = vector.shape_cast %111 : vector<1x8xf32> to vector<1x8x1xf32>
    %113 = tpu.reciprocal %112 {approx = true} : vector<1x8x1xf32> -> vector<1x8x1xf32>
    %114 = vector.broadcast %113 : vector<1x8x1xf32> to vector<1x8x16xf32>
    %115 = arith.mulf %110, %114 : vector<1x8x16xf32>
    %116 = arith.truncf %115 : vector<1x8x16xf32> to vector<1x8x16xbf16>
    "tpu.trace_start"() <{level = 10 : i32, message = "bmn,bnd->bmd"}> : () -> ()
    %cst_27 = arith.constant dense<0.000000e+00> : vector<1x8x32xf32>
    %117 = tpu.matmul %116, %104, %cst_27 {dimension_numbers = #tpu.dot_dimension_numbers<[2], [1], [1], [2], [0, 0, 0, 1, 1, 2], [0], [0]>} : vector<1x8x16xbf16>, vector<1x16x32xbf16>, vector<1x8x32xf32> -> vector<1x8x32xf32>
    "tpu.trace_stop"() : () -> ()
    %118 = tpu.concatenate %51, %73, %95, %117 in 2 : vector<1x8x32xf32>, vector<1x8x32xf32>, vector<1x8x32xf32>, vector<1x8x32xf32> -> vector<1x8x128xf32>
    %119 = vector.shape_cast %118 : vector<1x8x128xf32> to vector<8x128xf32>
    %120 = arith.truncf %119 : vector<8x128xf32> to vector<8x128xbf16>
    %121 = vector.extract_strided_slice %3 {offsets = [3, 0, 0], sizes = [1, 128, 128], strides = [1, 1, 1]} : vector<5x128x128xbf16> to vector<1x128x128xbf16>
    %122 = vector.shape_cast %121 : vector<1x128x128xbf16> to vector<128x128xbf16>
    %cst_28 = arith.constant dense<0.000000e+00> : vector<8x128xf32>
    %123 = tpu.matmul %120, %122, %cst_28 {dimension_numbers = #tpu.dot_dimension_numbers<[1], [0], [0], [1], [0, 0, 1, 1], [], []>} : vector<8x128xbf16>, vector<128x128xbf16>, vector<8x128xf32> -> vector<8x128xf32>
    %124 = vector.extract_strided_slice %4 {offsets = [3, 0], sizes = [1, 128], strides = [1, 1]} : vector<9x128xf32> to vector<1x128xf32>
    %125 = vector.broadcast %124 : vector<1x128xf32> to vector<8x128xf32>
    %126 = arith.addf %123, %125 : vector<8x128xf32>
    %127 = arith.addf %17, %126 : vector<8x128xf32>
    %128 = vector.extract_strided_slice %4 {offsets = [5, 0], sizes = [1, 128], strides = [1, 1]} : vector<9x128xf32> to vector<1x128xf32>
    %129 = vector.extract_strided_slice %4 {offsets = [6, 0], sizes = [1, 128], strides = [1, 1]} : vector<9x128xf32> to vector<1x128xf32>
    %cst_29 = arith.constant dense<0.000000e+00> : vector<8xf32>
    %130 = vector.multi_reduction <add>, %127, %cst_29 [1] : vector<8x128xf32> to vector<8xf32>
    %131 = vector.shape_cast %130 : vector<8xf32> to vector<8x1xf32>
    %cst_30 = arith.constant 3.125000e-02 : f32
    %132 = vector.broadcast %cst_30 : f32 to vector<8x1xf32>
    %133 = arith.mulf %131, %132 : vector<8x1xf32>
    %134 = vector.broadcast %133 : vector<8x1xf32> to vector<8x128xf32>
    %135 = arith.subf %127, %134 : vector<8x128xf32>
    %136 = arith.mulf %135, %135 : vector<8x128xf32>
    %cst_31 = arith.constant dense<0.000000e+00> : vector<8xf32>
    %137 = vector.multi_reduction <add>, %136, %cst_31 [1] : vector<8x128xf32> to vector<8xf32>
    %138 = vector.shape_cast %137 : vector<8xf32> to vector<8x1xf32>
    %139 = arith.mulf %133, %133 : vector<8x1xf32>
    %cst_32 = arith.constant 9.600000e+01 : f32
    %140 = vector.broadcast %cst_32 : f32 to vector<8x1xf32>
    %141 = arith.mulf %140, %139 : vector<8x1xf32>
    %142 = arith.subf %138, %141 : vector<8x1xf32>
    %cst_33 = arith.constant 3.125000e-02 : f32
    %143 = vector.broadcast %cst_33 : f32 to vector<8x1xf32>
    %144 = arith.mulf %142, %143 : vector<8x1xf32>
    %cst_34 = arith.constant 9.99999974E-6 : f32
    %145 = vector.broadcast %cst_34 : f32 to vector<8x1xf32>
    %146 = arith.addf %144, %145 : vector<8x1xf32>
    %147 = math.rsqrt %146 : vector<8x1xf32>
    %148 = vector.broadcast %147 : vector<8x1xf32> to vector<8x128xf32>
    %149 = arith.mulf %135, %148 : vector<8x128xf32>
    %150 = vector.broadcast %128 : vector<1x128xf32> to vector<8x128xf32>
    %151 = arith.mulf %149, %150 : vector<8x128xf32>
    %152 = vector.broadcast %129 : vector<1x128xf32> to vector<8x128xf32>
    %153 = arith.addf %151, %152 : vector<8x128xf32>
    %154 = arith.truncf %153 : vector<8x128xf32> to vector<8x128xbf16>
    %155 = vector.extract_strided_slice %3 {offsets = [4, 0, 0], sizes = [1, 128, 128], strides = [1, 1, 1]} : vector<5x128x128xbf16> to vector<1x128x128xbf16>
    %156 = vector.shape_cast %155 : vector<1x128x128xbf16> to vector<128x128xbf16>
    %cst_35 = arith.constant dense<0.000000e+00> : vector<8x128xf32>
    %157 = tpu.matmul %154, %156, %cst_35 {dimension_numbers = #tpu.dot_dimension_numbers<[1], [0], [0], [1], [0, 0, 1, 1], [], []>} : vector<8x128xbf16>, vector<128x128xbf16>, vector<8x128xf32> -> vector<8x128xf32>
    %158 = vector.extract_strided_slice %4 {offsets = [4, 0], sizes = [1, 128], strides = [1, 1]} : vector<9x128xf32> to vector<1x128xf32>
    %159 = vector.broadcast %158 : vector<1x128xf32> to vector<8x128xf32>
    %160 = arith.addf %157, %159 : vector<8x128xf32>
    %cst_36 = arith.constant 0.000000e+00 : f32
    %161 = vector.broadcast %cst_36 : f32 to vector<8x128xf32>
    %162 = arith.maximumf %160, %161 : vector<8x128xf32>
    %163 = arith.addf %153, %162 : vector<8x128xf32>
    %164 = vector.extract_strided_slice %4 {offsets = [7, 0], sizes = [1, 128], strides = [1, 1]} : vector<9x128xf32> to vector<1x128xf32>
    %165 = vector.extract_strided_slice %4 {offsets = [8, 0], sizes = [1, 128], strides = [1, 1]} : vector<9x128xf32> to vector<1x128xf32>
    %cst_37 = arith.constant dense<0.000000e+00> : vector<8xf32>
    %166 = vector.multi_reduction <add>, %163, %cst_37 [1] : vector<8x128xf32> to vector<8xf32>
    %167 = vector.shape_cast %166 : vector<8xf32> to vector<8x1xf32>
    %cst_38 = arith.constant 3.125000e-02 : f32
    %168 = vector.broadcast %cst_38 : f32 to vector<8x1xf32>
    %169 = arith.mulf %167, %168 : vector<8x1xf32>
    %170 = vector.broadcast %169 : vector<8x1xf32> to vector<8x128xf32>
    %171 = arith.subf %163, %170 : vector<8x128xf32>
    %172 = arith.mulf %171, %171 : vector<8x128xf32>
    %cst_39 = arith.constant dense<0.000000e+00> : vector<8xf32>
    %173 = vector.multi_reduction <add>, %172, %cst_39 [1] : vector<8x128xf32> to vector<8xf32>
    %174 = vector.shape_cast %173 : vector<8xf32> to vector<8x1xf32>
    %175 = arith.mulf %169, %169 : vector<8x1xf32>
    %cst_40 = arith.constant 9.600000e+01 : f32
    %176 = vector.broadcast %cst_40 : f32 to vector<8x1xf32>
    %177 = arith.mulf %176, %175 : vector<8x1xf32>
    %178 = arith.subf %174, %177 : vector<8x1xf32>
    %cst_41 = arith.constant 3.125000e-02 : f32
    %179 = vector.broadcast %cst_41 : f32 to vector<8x1xf32>
    %180 = arith.mulf %178, %179 : vector<8x1xf32>
    %cst_42 = arith.constant 9.99999974E-6 : f32
    %181 = vector.broadcast %cst_42 : f32 to vector<8x1xf32>
    %182 = arith.addf %180, %181 : vector<8x1xf32>
    %183 = math.rsqrt %182 : vector<8x1xf32>
    %184 = vector.broadcast %183 : vector<8x1xf32> to vector<8x128xf32>
    %185 = arith.mulf %171, %184 : vector<8x128xf32>
    %186 = vector.broadcast %164 : vector<1x128xf32> to vector<8x128xf32>
    %187 = arith.mulf %185, %186 : vector<8x128xf32>
    %188 = vector.broadcast %165 : vector<1x128xf32> to vector<8x128xf32>
    %189 = arith.addf %187, %188 : vector<8x128xf32>
    %190 = vector.shape_cast %189 : vector<8x128xf32> to vector<1x8x128xf32>
    %c0_43 = arith.constant 0 : index
    %c0_44 = arith.constant 0 : index
    %c0_45 = arith.constant 0 : index
    %191 = vector.load %arg5[%c0_43, %c0_44, %c0_45] : memref<1x8x128xf32, #tpu.memory_space<vmem>>, vector<1x8x128xf32>
    tpu.vector_store %arg5[%c0_43, %c0_44, %c0_45], %190 {strides = array<i32>} : memref<1x8x128xf32, #tpu.memory_space<vmem>>, vector<1x8x128xf32>,
    return
  }
  func.func @transform_0(%arg0: i32) -> (i32, i32, i32) {
    %c0_i32 = arith.constant 0 : i32
    %c0_i32_0 = arith.constant 0 : i32
    %c0_i32_1 = arith.constant 0 : i32
    %c0_i32_2 = arith.constant 0 : i32
    return %c0_i32, %c0_i32_0, %c0_i32_1 : i32, i32, i32
  }
  func.func @transform_1(%arg0: i32) -> (i32, i32, i32) {
    %c0_i32 = arith.constant 0 : i32
    %c0_i32_0 = arith.constant 0 : i32
    %c0_i32_1 = arith.constant 0 : i32
    return %arg0, %c0_i32, %c0_i32_0 : i32, i32, i32
  }
  func.func @transform_2(%arg0: i32) -> (i32, i32, i32) {
    %c0_i32 = arith.constant 0 : i32
    %c0_i32_0 = arith.constant 0 : i32
    %c0_i32_1 = arith.constant 0 : i32
    %c0_i32_2 = arith.constant 0 : i32
    return %c0_i32, %c0_i32_0, %c0_i32_1 : i32, i32, i32
  }
  func.func @transform_3(%arg0: i32) -> (i32, i32) {
    %c0_i32 = arith.constant 0 : i32
    %c0_i32_0 = arith.constant 0 : i32
    %c0_i32_1 = arith.constant 0 : i32
    return %c0_i32, %c0_i32_0 : i32, i32
  }
  func.func @transform_4(%arg0: i32) -> (i32, i32, i32) {
    %c0_i32 = arith.constant 0 : i32
    %c0_i32_0 = arith.constant 0 : i32
    %c0_i32_1 = arith.constant 0 : i32
    return %arg0, %c0_i32, %c0_i32_0 : i32, i32, i32
  }
}

</mosaic_0001>

<bundles_post_ra>
// kernel: tpu_custom_call.1
= control target key start
LH: loop header
LB: loop body
LE: loop exit
PB: predicated region body
PF: predicated region fallthrough
CT: control target
= control target key end

     0   :  { %s2497_s0 = inlined_call_operand.hbm [shape: f32[1,8,128], index: 0, kind: input, shape index: {}]   ;;  %s2498_s1 = inlined_call_operand.hbm [shape: f32[2,16,128], index: 1, kind: input, shape index: {}]   ;;  %s2499_s2 = inlined_call_operand.hbm [shape: bf16[5,128,128], index: 2, kind: input, shape index: {}]   ;;  %s2500_s3 = inlined_call_operand.hbm [shape: f32[9,128], index: 3, kind: input, shape index: {}]   ;;  %s2501_s4 = inlined_call_operand.hbm [shape: f32[2,8,128], index: 4, kind: output, shape index: {}]  }
   0x1   :  { %2507 = sst [smem:[#allocation16_spill]] %s2497_s0 }
   0x2   :  { %9 = vsyncpa [#allocation3], 0 }
   0x3   :  { %10 = vsyncpa [#allocation6], 0 }
   0x4   :  { %12 = vsyncpa [#allocation6 + $0x1], 0 }
   0x5   :  { %13 = vsyncpa [#allocation9], 0 }
   0x6   :  { %14 = vsyncpa [#allocation4], 0 }
   0x7   :  { %16 = vsyncpa [#allocation4 + $0x1], 0  ;;  %s2084_s15 = smov 0   ;;  %s2086_s16 = smov 0  }
   0x8   :  { %s2088_s17 = smov 0   ;;  %s2090_s18 = smov 0  }
   0x9 LB: > { %s2105_s19 = sadd.s32 4294967295, %s2043_s18   ;;  %s1427_s20 = sadd.s32 4294967294, %s2043_s18   ;;  %s2043_s18 = sphi %s2090_s18, %s2534_s18   ;;  %s2039_s17 = sphi %s2088_s17, %s2533_s17   ;;  %s2035_s16 = sphi %s2086_s16, %s2532_s16   ;;  %s2031_s15 = sphi %s2084_s15, %s2531_s15  }
   0xa   : > { %s2109_s21 = sadd.s32 1, %s2043_s18   ;;  %s50_s22 = sadd.s32 1, %s2039_s17 }
   0xb   : > { %s47_s23 = ssub.s32 %s2043_s18, %s2109_s21  ;;  %p57_p0 = scmp.ne.s32.totalorder %s2039_s17, %s2035_s16 }
   0xc   : > { %p48_p1 = scmp.eq.s32.totalorder %s47_s23, 0  ;;  %p58_p2 = scmp.eq.s32.totalorder %s2043_s18, 0 }
   0xd   : > { %p63_p3 = scmp.ne.s32.totalorder %s2035_s16, %s2031_s15  ;;  %p2502_p4 = scmp.eq.s32.totalorder %s2105_s19, 0 }
   0xe   : > { %s2121_s24 = scalar_select %p48_p1, %s2039_s17, %s50_s22  }
   0xf   : > { %p2123_p5 = por %p58_p2, %p57_p0  ;;  %p2129_p6 = por %p2502_p4, %p63_p3 }
  0x10   : > { %p129_p7 = scmp.eq.s32.totalorder %s2105_s19, 1  ;;  %p135_p8 = scmp.eq.s32.totalorder %s1427_s20, 1 }
  0x11   : > { %s2508_s25 = scalar_select %p2123_p5, 1, 0 }
  0x12   : > { %s2509_s26 = scalar_select %p2129_p6, 1, 0 }
  0x13   : > { %p1428_p9 = scmp.ge.s32.totalorder %s2043_s18, 1  ;;  %p142_p10 = scmp.lt.s32.totalorder %s2043_s18, 3 }
  0x14   : > { %p2136_p11 = por %p129_p7, %p57_p0  ;;  %p2140_p12 = por %p135_p8, %p63_p3 }
  0x15   : > { %p2144_p13 = pnand %p1428_p9, %p142_p10  ;;  %s2045_s30 = smov [#allocation7]  }
  0x16   : > { %s2510_s27 = scalar_select %p2136_p11, 1, 0 }
  0x17   : > { %s2511_s28 = scalar_select %p2140_p12, 1, 0 }
  0x18   : > { %s2512_s29 = scalar_select %p2144_p13, 1, 0 }
  0x19   : > { %p1721_p1 = pneg %p2144_p13  ;;  %s165_s5 = sshll.u32 %s2045_s30, 4  ;;  %s166_s5 = int_to_ptr.vmem [resolvable:$true] %s165_s5 }
  0x1a   : > { %s2046_s7 = smov [#allocation2]   ;;  %s1851_s11 = scalar_lea.hbm %s2499_s2, 5120 }
  0x1b   : > { %p2152_p2 = pnand %p1721_p1, %p2502_p4  ;;  %s155_s8 = sshll.u32 %s2046_s7, 4  ;;  %s156_s8 = int_to_ptr.vmem [resolvable:$true] %s155_s8 }
  0x1c   : > { %p1852_p7 = scmp.ne.s32.totalorder %s2499_s2, %s1851_s11  ;;  %p1858_p1 = scmp.lt.u32.totalorder %s1851_s11, %s2499_s2 }
  0x1d   : > { %p2166_p8 = pneg %p2152_p2 }
  0x1f   : > { %p1854_p9 = pnand %p2166_p8, %p1852_p7 }
  0x21   : > { %p1855_p10 = pneg %p1854_p9 }
  0x23   : > { %p1860_p0 = pnand %p1858_p1, %p1855_p10 }
  0x25   : > { %1863 = shalt.err (!%p1860_p0)
}
  0x26   : > { %s1864_s23 = scalar_lea.vmem %s166_s5, 5120  ;;  %p1872_p11 = scmp.lt.s32.totalorder %s166_s5, %s166_s5 }
  0x27   : > { %p1865_p4 = scmp.ne.s32.totalorder %s166_s5, %s1864_s23  ;;  %p1873_p6 = scmp.lt.s32.totalorder %s1864_s23, %s1864_s23 }
  0x29   : > { %p1867_p3 = pnand %p1865_p4, %p2166_p8  ;;  %p1874_p13 = por %p1873_p6, %p1872_p11 }
  0x2b   : > { %p1868_p12 = pneg %p1867_p3 }
  0x2d   : > { %p1875_p5 = pnand %p1874_p13, %p1868_p12 }
  0x2f   : > { %1878 = shalt.err (!%p1875_p5)
}
  0x30   : > { %s2047_s30 = smov 64   ;;  %s2048_s7 = smov 4  }
  0x31   : > { %1727 = dma.hbm_to_vmem [thread:$0]  (!%p2152_p2), %s2499_s2, 5120, %s166_s5, [#allocation6], %s2047_s30, %s2047_s30, %s2048_s7  }
  0x32   : > { %p2515_p0 = scmp.ne.s32.totalorder %s2508_s25, 0  ;;  %p2516_p7 = scmp.lt.s32.totalorder %s2043_s18, 2 }
  0x33   : > { %s2518_s0 = sld [smem:[#allocation16_spill]] }
  0x34   : > { %p2186_p4 = pnand %p2516_p7, %p2515_p0 }
  0x36   : > { %s2517_s11 = scalar_select %p2186_p4, 1, 0 }
  0x39   : > { %s1879_s20 = scalar_lea.hbm %s2518_s0, 128 }
  0x3a   : > { %p1880_p5 = scmp.ne.s32.totalorder %s2518_s0, %s1879_s20  ;;  %p1886_p12 = scmp.lt.u32.totalorder %s1879_s20, %s2518_s0 }
  0x3c   : > { %p1882_p6 = pnand %p1880_p5, %p2166_p8 }
  0x3e   : > { %p1883_p11 = pneg %p1882_p6 }
  0x40   : > { %p1888_p13 = pnand %p1886_p12, %p1883_p11 }
  0x42   : > { %1891 = shalt.err (!%p1888_p13)
}
  0x43   : > { %s1892_s25 = scalar_lea.vmem %s156_s8, 128  ;;  %p1900_p1 = scmp.lt.s32.totalorder %s156_s8, %s156_s8 }
  0x44   : > { %p1893_p3 = scmp.ne.s32.totalorder %s156_s8, %s1892_s25  ;;  %p1901_p0 = scmp.lt.s32.totalorder %s1892_s25, %s1892_s25 }
  0x46   : > { %p1895_p9 = pnand %p1893_p3, %p2166_p8  ;;  %p1902_p7 = por %p1901_p0, %p1900_p1 }
  0x48   : > { %p1896_p10 = pneg %p1895_p9 }
  0x4a   : > { %p1903_p4 = pnand %p1902_p7, %p1896_p10 }
  0x4c   : > { %1906 = shalt.err (!%p1903_p4)
}
  0x4d   : > { %1724 = dma.hbm_to_vmem [thread:$0]  (!%p2152_p2), %s2518_s0, 128, %s156_s8, [#allocation3]  }
  0x4e   : > { %s2049_s10 = smov [#allocation8]   ;;  %s1907_s22 = scalar_lea.hbm %s2500_s3, 256 }
  0x4f   : > { %s178_s12 = sshll.u32 %s2049_s10, 4  ;;  %p1908_p5 = scmp.ne.s32.totalorder %s2500_s3, %s1907_s22  ;;  %s179_s12 = int_to_ptr.vmem [resolvable:$true] %s178_s12 }
  0x50   : > { %p1914_p11 = scmp.lt.u32.totalorder %s1907_s22, %s2500_s3 }
  0x51   : > { %p1910_p4 = pnand %p1908_p5, %p2166_p8 }
  0x53   : > { %p1911_p6 = pneg %p1910_p4 }
  0x55   : > { %p1916_p12 = pnand %p1914_p11, %p1911_p6 }
  0x57   : > { %1919 = shalt.err (!%p1916_p12)
}
  0x58   : > { %s1920_s8 = scalar_lea.vmem %s179_s12, 256  ;;  %p1928_p10 = scmp.lt.s32.totalorder %s179_s12, %s179_s12 }
  0x59   : > { %p1921_p13 = scmp.ne.s32.totalorder %s179_s12, %s1920_s8  ;;  %p1929_p1 = scmp.lt.s32.totalorder %s1920_s8, %s1920_s8 }
  0x5b   : > { %p1923_p3 = pnand %p1921_p13, %p2166_p8  ;;  %p1930_p0 = por %p1929_p1, %p1928_p10 }
  0x5d   : > { %p1924_p9 = pneg %p1923_p3 }
  0x5f   : > { %p1931_p7 = pnand %p1930_p0, %p1924_p9 }
  0x61   : > { %1934 = shalt.err (!%p1931_p7)
}
  0x62   : > { %s2050_s30 = smov 128   ;;  %s2051_s7 = smov 8  }
  0x63   : > { %1730 = dma.hbm_to_vmem [thread:$0]  (!%p2152_p2), %s2500_s3, 256, %s179_s12, [#allocation9], %s2050_s30, %s2050_s30, %s2051_s7  }
  0x64   : > { %s192_s13 = sand.u32 1, %s2043_s18   ;;  %s194_s20 = sand.u32 1, %s2039_s17  }
  0x65   : > { %s1433_s22 = sshll.u32 %s194_s20, 4  ;;  %s1495_s23 = sshll.u32 %s2043_s18, 8 }
  0x66   : > { %s2235_s25 = scalar_lea.hbm %s2498_s1, %s1495_s23  ;;  %s196_s6 = scalar_lea.vmem [#allocation5], %s1433_s22 }
  0x67   : > { %s203_s8 = sshll.u32 %s196_s6, 4  ;;  %s2239_s0 = scalar_lea.sflag [#allocation6], %s192_s13  ;;  %s2237_s8 = int_to_ptr.vmem [resolvable:$true] %s203_s8 }
  0x68   : > { %s1935_s12 = scalar_lea.hbm %s2235_s25, 256  ;;  %p2519_p8 = scmp.ne.s32.totalorder %s2517_s11, 0 }
  0x69   : > { %p1936_p2 = scmp.ne.s32.totalorder %s2235_s25, %s1935_s12  ;;  %s1940_s20 = scalar_lea.hbm %s2498_s1, 512 }
  0x6a   : > { %p1937_p5 = pneg %p2519_p8  ;;  %p1941_p11 = scmp.lt.u32.totalorder %s2235_s25, %s2498_s1 }
  0x6b   : > { %p1942_p12 = scmp.lt.u32.totalorder %s1940_s20, %s1935_s12  ;;  %p1944_p3 = scmp.lt.u32.totalorder %s1935_s12, %s2235_s25 }
  0x6c   : > { %p1938_p4 = pnand %p1937_p5, %p1936_p2 }
  0x6d   : > { %p1943_p13 = por %p1942_p12, %p1941_p11 }
  0x6e   : > { %p1939_p6 = pneg %p1938_p4 }
  0x6f   : > { %p1945_p9 = por %p1944_p3, %p1943_p13 }
  0x71   : > { %p1946_p10 = pnand %p1945_p9, %p1939_p6 }
  0x73   : > { %1949 = shalt.err (!%p1946_p10)
}
  0x74   : > { %s1950_s13 = scalar_lea.vmem %s2237_s8, 256  ;;  %s2052_s22 = smov [#allocation5]  }
  0x75   : > { %p1951_p1 = scmp.ne.s32.totalorder %s2237_s8, %s1950_s13  ;;  %s1955_s5 = sshll.u32 %s2052_s22, 4  ;;  %s1956_s5 = int_to_ptr.vmem [resolvable:$false] %s1955_s5 }
  0x76   : > { %s1957_s6 = scalar_lea.vmem %s1956_s5, 512  ;;  %p1958_p2 = scmp.lt.s32.totalorder %s2237_s8, %s1956_s5 }
  0x77   : > { %p1953_p0 = pnand %p1951_p1, %p1937_p5  ;;  %p1959_p4 = scmp.lt.s32.totalorder %s1957_s6, %s1950_s13 }
  0x79   : > { %p1954_p7 = pneg %p1953_p0  ;;  %p1960_p11 = por %p1959_p4, %p1958_p2 }
  0x7b   : > { %p1961_p12 = pnand %p1960_p11, %p1954_p7 }
  0x7d   : > { %1964 = shalt.err (!%p1961_p12)
}
  0x7e   : > { %1734 = dma.hbm_to_vmem [thread:$0]  (!%p2519_p8), %s2235_s25, 256, %s2237_s8, %s2239_s0, %s2050_s30, %s2050_s30, %s2051_s7  }
  0x7f   : > { %p2520_p5 = scmp.ne.s32.totalorder %s2512_s29, 0 }
  0x80   : > { %p2521_p6 = scmp.eq.s32.totalorder (!%p2520_p5), %s2105_s19, 0 }
  0x81   : > { %215 = sbr.rel (%p2520_p5) target bundleno = 2902 (0xb56), region = 36 }
  0x88   : > { %2010 = dma.done.wait (%p2521_p6), [#allocation3], 128   ;;  %p2522_p13 = pmov %p2521_p6 }
  0x89   : > { %s221_s11 = sand.u32 1, %s2105_s19   ;;  %s2278_s12 = sand.u32 1, %s2035_s16  }
  0x8a   : > { %2012 = vsyncadd (%p2522_p13), [#allocation3], 4294967168  ;;  %s1438_s14 = sshll.u32 %s2278_s12, 4  ;;  %s222_s10 = scalar_lea.sflag [#allocation6], %s221_s11 }
  0x8b   : > { %s2281_s20 = scalar_lea.vmem [#allocation5], %s1438_s14  ;;  %p2523_p8 = scmp.ne.s32.totalorder %s2509_s26, 0 }
  0x8d   : > { %2014 = dma.done.wait (%p2523_p8), %s222_s10, 256  }
  0x8e   : > { %2016 = vsyncadd (%p2523_p8), %s222_s10, 4294967040  ;;  %p2524_p3 = pmov %p2521_p6 }
  0x90   : > { %2018 = dma.done.wait (%p2524_p3), [#allocation6], 5120   ;;  %p2525_p9 = pmov %p2524_p3 }
  0x91   : > { %p2526_p10 = pmov %p2524_p3 }
  0x92   : > { %2020 = vsyncadd (%p2525_p9), [#allocation6], 4294962176 }
  0x93   : > { %2022 = dma.done.wait (%p2526_p10), [#allocation9], 256   ;;  %p2527_p1 = pmov %p2524_p3 }
  0x94   : > { %v2053_v0 = vmov 0.0   ;;  %vm2054_vm0 = vmmov 0   ;;  %v1791_v1 = vld [vmem:[#allocation7 + $0x40] sm:$0xff]   ;;  %v1792_v2 = vld [vmem:[#allocation7 + $0x48] sm:$0xff]   ;;  %v1794_v5 = vld [vmem:[#allocation7 + $0x50] sm:$0xff]   ;;  %v346_v22 = vlaneseq  ;;  %vm627_vm1 = vcmask 261120  }
  0x95   : > { %2024 = vsyncadd (%p2527_p1), [#allocation9], 4294967040  ;;  %1577 = vmatprep.subr.bf16.mxu1 %v2053_v0  ;;  %1557 = vmatprep.subr.bf16.mxu0 %v2053_v0  ;;  %v1793_v3 = vld [vmem:[#allocation7] sm:$0xff]   ;;  %v1795_v4 = vld [vmem:[#allocation7 + $0x8] sm:$0xff]   ;;  %s2055_s0 = smov 96   ;;  %s2056_s26 = smov 64  }
  0x96   : > { %1593 = vmatprep.mubr.msk.bf16.mxu1 %vm2054_vm0, %v2053_v0  ;;  %1573 = vmatprep.mubr.msk.bf16.mxu0 %vm2054_vm0, %v2053_v0  ;;  %v1797_v6 = vld [vmem:[#allocation7 + $0x10] sm:$0xff]   ;;  %v1796_v7 = vld [vmem:[#allocation7 + $0x58] sm:$0xff]   ;;  %v1798_v9 = vld [vmem:[#allocation7 + $0x60] sm:$0xff]   ;;  %v2330_v23 = vshrl.u32 %v346_v22, 7  ;;  %s2057_s29 = smov 32   ;;  %vm674_vm2 = vcmask 130048  }
  0x97   : > { %1578 = vmatpush3.bf16.msra.mxu1 %v1791_v1  ;;  %1558 = vmatpush3.bf16.msra.mxu0 %v1793_v3  ;;  %v1799_v8 = vld [vmem:[#allocation7 + $0x18] sm:$0xff]   ;;  %v1801_v10 = vld [vmem:[#allocation7 + $0x20] sm:$0xff]   ;;  %v1800_v11 = vld [vmem:[#allocation7 + $0x68] sm:$0xff]   ;;  %vm1070_vm3 = vcmask 523264   ;;  %vm1072_vm4 = vcmask 785408   ;;  %s1441_s30 = sshll.u32 %s2278_s12, 3 }
  0x98   : > { %1579 = vmatprep.subr.bf16.mxu1 %v2053_v0  ;;  %1559 = vmatprep.subr.bf16.mxu0 %v2053_v0  ;;  %v1803_v12 = vld [vmem:[#allocation7 + $0x28] sm:$0xff]   ;;  %v1802_v13 = vld [vmem:[#allocation7 + $0x70] sm:$0xff]   ;;  %v1804_v15 = vld [vmem:[#allocation7 + $0x78] sm:$0xff]   ;;  %v440_v24 = vsub.s32 1, %v2330_v23  ;;  %v348_v25 = vsub.s32 0, %v2330_v23  ;;  %v533_v56 = vsub.s32 2, %v2330_v23 }
  0x99   : > { %v1805_v14 = vld [vmem:[#allocation7 + $0x30] sm:$0xff]   ;;  %v260_v17 = vld [vmem:[%s2281_s20 + $0x8] sm:$0xff]  ;;  %v2334_v26 = vld [vmem:[#allocation8] sm:$0xff]  ;;  %s1492_s7 = sshll.u32 %s2105_s19, 7  ;;  %s257_s25 = scalar_lea.vmem [#allocation10], %s1441_s30 }
  0x9a   : > { %v259_v16 = vld [vmem:[%s2281_s20] sm:$0xff]  ;;  %v1806_v18 = vld [vmem:[#allocation7 + $0x38] sm:$0xff]   ;;  %v441_v27 = vrot.slane %v2334_v26, %v440_v24  ;;  %v349_v28 = vrot.slane %v2334_v26, %v348_v25  ;;  %v1808_v44 = vld [vmem:[#allocation7 + $0x88] sm:$0xff]   ;;  %v534_v57 = vrot.slane %v2334_v26, %v533_v56  ;;  %s1326_s8 = sshll.u32 %s257_s25, 4  ;;  %s2453_s13 = scalar_lea.hbm %s2501_s4, %s1492_s7  ;;  %s2455_s8 = int_to_ptr.vmem [resolvable:$true] %s1326_s8 }
  0x9b   : > { %1580 = vmatpush3.bf16.msra.mxu1 %v1792_v2  ;;  %1560 = vmatpush3.bf16.msra.mxu0 %v1795_v4  ;;  %v2315_v19 = vld [vmem:[#allocation2] sm:$0xff]  ;;  %v2318_v20 = vpack.c.bf16 %v260_v17, %v259_v16  ;;  %v1807_v43 = vld [vmem:[#allocation7 + $0x80] sm:$0xff]   ;;  %v1809_v45 = vld [vmem:[#allocation7 + $0x90] sm:$0xff]   ;;  %s1313_s22 = scalar_lea.sflag [#allocation4], %s2278_s12  ;;  %s1965_s5 = scalar_lea.vmem %s2455_s8, 128 }
  0x9c   : > { %1581 = vmatprep.subr.bf16.mxu1 %v2053_v0  ;;  %1561 = vmatprep.subr.bf16.mxu0 %v2053_v0  ;;  %v345_v21 = vpack.c.bf16 %v2315_v19, %v2315_v19  ;;  %v1810_v46 = vld [vmem:[#allocation7 + $0x98] sm:$0xff]   ;;  %v1811_v47 = vld [vmem:[#allocation7 + $0xa0] sm:$0xff]   ;;  %v1812_v48 = vld [vmem:[#allocation7 + $0xa8] sm:$0xff]   ;;  %p1966_p0 = scmp.ne.s32.totalorder %s2455_s8, %s1965_s5  ;;  %p2528_p7 = scmp.ne.s32.totalorder %s2510_s27, 0 }
  0x9d   : > { %v1813_v49 = vld [vmem:[#allocation7 + $0xb0] sm:$0xff]   ;;  %v1814_v50 = vld [vmem:[#allocation7 + $0xb8] sm:$0xff]   ;;  %s2058_s19 = smov [#allocation10]  }
  0x9e   : > { %p1967_p2 = pnand %p1966_p0, %p2528_p7  ;;  %s1969_s6 = sshll.u32 %s2058_s19, 4  ;;  %s1970_s6 = int_to_ptr.vmem [resolvable:$false] %s1969_s6 }
  0x9f   : > { %1582 = vmatpush3.bf16.msra.mxu1 %v1794_v5  ;;  %1562 = vmatpush3.bf16.msra.mxu0 %v1797_v6  ;;  %s1971_s11 = scalar_lea.vmem %s1970_s6, 256  ;;  %p1972_p11 = scmp.lt.s32.totalorder %s2455_s8, %s1970_s6 }
  0xa0   : > { %1583 = vmatprep.subr.bf16.mxu1 %v2053_v0  ;;  %1563 = vmatprep.subr.bf16.mxu0 %v2053_v0  ;;  %p1968_p4 = pneg %p1967_p2  ;;  %p1973_p12 = scmp.lt.s32.totalorder %s1971_s11, %s1965_s5 }
  0xa2   : > { %p1974_p5 = por %p1973_p12, %p1972_p11 }
  0xa3   : > { %1584 = vmatpush3.bf16.msra.mxu1 %v1796_v7  ;;  %1564 = vmatpush3.bf16.msra.mxu0 %v1799_v8 }
  0xa4   : > { %1585 = vmatprep.subr.bf16.mxu1 %v2053_v0  ;;  %1565 = vmatprep.subr.bf16.mxu0 %v2053_v0  ;;  %p1975_p6 = pnand %p1974_p5, %p1968_p4 }
  0xa7   : > { %1586 = vmatpush3.bf16.msra.mxu1 %v1798_v9  ;;  %1566 = vmatpush3.bf16.msra.mxu0 %v1801_v10 }
  0xa8   : > { %1587 = vmatprep.subr.bf16.mxu1 %v2053_v0  ;;  %1567 = vmatprep.subr.bf16.mxu0 %v2053_v0 }
  0xab   : > { %1588 = vmatpush3.bf16.msra.mxu1 %v1800_v11  ;;  %1568 = vmatpush3.bf16.msra.mxu0 %v1803_v12 }
  0xac   : > { %1589 = vmatprep.subr.bf16.mxu1 %v2053_v0  ;;  %1569 = vmatprep.subr.bf16.mxu0 %v2053_v0 }
  0xaf   : > { %1590 = vmatpush3.bf16.msra.mxu1 %v1802_v13  ;;  %1570 = vmatpush3.bf16.msra.mxu0 %v1805_v14 }
  0xb0   : > { %1591 = vmatprep.subr.bf16.mxu1 %v2053_v0  ;;  %1571 = vmatprep.subr.bf16.mxu0 %v2053_v0 }
  0xb3   : > { %1592 = vmatpush3.bf16.msra.mxu1 %v1804_v15  ;;  %1572 = vmatpush3.bf16.msra.mxu0 %v1806_v18 }
  0xb4   : > { %1617 = vmatprep.subr.bf16.mxu1 %v2053_v0  ;;  %1597 = vmatprep.subr.bf16.mxu0 %v2053_v0 }
  0xb6   : > { %1594 = vmatmul.mubr.bf16.vlgmr.msra.gmra.mrb[0].mxu1 %v2318_v20  ;;  %1574 = vmatmul.mubr.bf16.vlgmr.msra.gmra.mrb[0].mxu0 %v345_v21 }
  0xb7   : > { %1619 = vmatprep.mubr.msk.bf16.mxu1 %vm2054_vm0, %v2053_v0  ;;  %1613 = vmatprep.mubr.msk.bf16.mxu0 %vm2054_vm0, %v2053_v0 }
  0xb8   : > { %1598 = vmatpush3.bf16.msra.mxu0 %v1807_v43 }
  0xb9   : > { %1599 = vmatprep.subr.bf16.mxu0 %v2053_v0 }
  0xbc   : > { %1600 = vmatpush3.bf16.msra.mxu0 %v1808_v44 }
  0xbd   : > { %1601 = vmatprep.subr.bf16.mxu0 %v2053_v0 }
  0xc0   : > { %1602 = vmatpush3.bf16.msra.mxu0 %v1809_v45 }
  0xc1   : > { %1603 = vmatprep.subr.bf16.mxu0 %v2053_v0 }
  0xc4   : > { %1604 = vmatpush3.bf16.msra.mxu0 %v1810_v46 }
  0xc5   : > { %1605 = vmatprep.subr.bf16.mxu0 %v2053_v0 }
  0xc8   : > { %1606 = vmatpush3.bf16.msra.mxu0 %v1811_v47 }
  0xc9   : > { %1607 = vmatprep.subr.bf16.mxu0 %v2053_v0 }
  0xcc   : > { %1608 = vmatpush3.bf16.msra.mxu0 %v1812_v48 }
  0xcd   : > { %1609 = vmatprep.subr.bf16.mxu0 %v2053_v0 }
  0xd0   : > { %1610 = vmatpush3.bf16.msra.mxu0 %v1813_v49 }
  0xd1   : > { %1611 = vmatprep.subr.bf16.mxu0 %v2053_v0 }
  0xd4   : > { %1612 = vmatpush3.bf16.msra.mxu0 %v1814_v50 }
  0xd5   : > { %1641 = vmatprep.subr.bf16.mxu0 %v2053_v0 }
  0xd7   : > { %1614 = vmatmul.mubr.bf16.vlgmr.msra.gmra.mrb[4].mxu0 %v2318_v20 }
  0xd8   : > { %1643 = vmatprep.mubr.msk.bf16.mxu0 %vm2054_vm0, %v2053_v0 }
 0x189   : > { %v524_v29 = vpop.f32.mrb[0].mxu1  ;;  %v432_v32 = vpop.f32.mrb[0].mxu0 }
 0x18a   : > { %v1595_v30 = vpop.f32.mrb[1].mxu1  ;;  %v525_v33 = vadd.f32 %v524_v29, %v441_v27  ;;  %v433_v36 = vadd.f32 %v432_v32, %v349_v28  ;;  %v1575_v37 = vpop.f32.mrb[1].mxu0 }
 0x18b   : > { %v527_v31 = vpop.f32.mrb[2].mxu1  ;;  %v435_v38 = vpop.f32.mrb[2].mxu0 }
 0x18c   : > { %v528_v34 = vadd.f32 %v527_v31, %v441_v27  ;;  %v1596_v35 = vpop.f32.mrb[3].mxu1  ;;  %v1576_v40 = vpop.f32.mrb[3].mxu0  ;;  %v624_v41 = vpack.c.bf16 %v433_v36, %v433_v36 }
 0x18e   : > { %v2338_v39 = vpack.c.bf16 %v528_v34, %v525_v33 }
 0x190   : > { %734 = vrot.lane.b32.xlu1 %v2338_v39, %s2055_s0  ;;  %v632_v42 = vsel %vm627_vm1, %v2338_v39, 0 }
 0x191   : > { %1618 = vmatpush3.bf16.xpose.msra.mxu1 %v632_v42 }
 0x192   : > { %1623 = vmatprep.subr.bf16.mxu1 %v2053_v0 }
 0x194   : > { %731 = vrot.lane.b32.xlu1 %v624_v41, %s2055_s0 }
 0x198   : > { %841 = vrot.lane.b32.xlu1 %v624_v41, %s2056_s26  ;;  %1620 = vmatmul.mubr.msk.bf16.vlgmr.msra.gmra.mrb[4].mxu1 %vm627_vm1, %v624_v41 }
 0x199   : > { %1625 = vmatprep.mubr.msk.bf16.mxu1 %vm2054_vm0, %v2053_v0 }
 0x19c   : > { %951 = vrot.lane.b32.xlu1 %v2338_v39, %s2057_s29 }
 0x1a0   : > { %949 = vrot.lane.b32.xlu1 %v624_v41, %s2057_s29 }
 0x1aa   : > { %v617_v58 = vpop.f32.mrb[4].mxu0 }
 0x1ab   : > { %v618_v59 = vadd.f32 %v617_v58, %v534_v57  ;;  %v1615_v60 = vpop.f32.mrb[5].mxu0 }
 0x1ac   : > { %v620_v61 = vpop.f32.mrb[6].mxu0 }
 0x1ad   : > { %v621_v62 = vadd.f32 %v620_v61, %v534_v57  ;;  %v1616_v63 = vpop.f32.mrb[7].mxu0 }
 0x1af   : > { %v2367_v1 = vpack.c.bf16 %v621_v62, %v618_v59 }
 0x1b1   : > { %1624 = vmatpush3.bf16.msra.mxu1 %v2367_v1 }
 0x1b2   : > { %1629 = vmatprep.subr.bf16.mxu1 %v2053_v0 }
 0x202   : > { %v735_v7 = vpop.permute.xlu1 %734 }
 0x203   : > { %v740_v18 = vsel %vm627_vm1, %v735_v7, 0 }
 0x206   : > { %v732_v8 = vpop.permute.xlu1 %731 }
 0x20a   : > { %v842_v10 = vpop.permute.xlu1 %841 }
 0x20e   : > { %v952_v13 = vpop.permute.xlu1 %951 }
 0x20f   : > { %v957_v16 = vsel %vm627_vm1, %v952_v13, 0  ;;  %v1819_v13 = vld [vmem:[#allocation7 + $0xe0] sm:$0xff]  }
 0x212   : > { %v950_v20 = vpop.permute.xlu1 %949 }
 0x26b   : > { %v668_v51 = vpop.f32.mrb[4].mxu1 }
 0x26c   : > { %v1621_v52 = vpop.f32.mrb[5].mxu1  ;;  %v675_v53 = vsel %vm674_vm2, %v668_v51, -inf }
 0x26d   : > { %676 = vmax.xlane.f32.xlu0 %v675_v53  ;;  %v671_v54 = vpop.f32.mrb[6].mxu1 }
 0x26e   : > { %v1622_v55 = vpop.f32.mrb[7].mxu1 }
 0x2fa   : > { %v677_v2 = vpop.xlane.xlu0 %676 }
 0x2fb   : > { %v678_v3 = vsub.f32 %v668_v51, %v677_v2 }
 0x2fd   : > { %v679_v4 = vmul.f32 1.442695, %v678_v3 }
 0x2ff   : > { %1831 = vpow2.f32 %v679_v4 }
 0x309   : > { %v1832_v5 = vpop.eup %1831 }
 0x30a   : > { %v681_v6 = vsel %vm674_vm2, %v1832_v5, 0.0 }
 0x30b   : > { %682 = vadd.xlane.f32.xlu0 %v681_v6 }
 0x321   : > { %843 = vrot.lane.b32.xlu0 %v2338_v39, %s2056_s26 }
 0x398   : > { %v683_v9 = vpop.xlane.xlu0 %682 }
 0x399   : > { %1833 = vrcp.f32 %v683_v9  ;;  %v1815_v9 = vld [vmem:[#allocation7 + $0xc0] sm:$0xff]  }
 0x39c   : > { %v844_v11 = vpop.permute.xlu0 %843 }
 0x39d   : > { %v849_v12 = vsel %vm627_vm1, %v844_v11, 0  ;;  %v1817_v11 = vld [vmem:[#allocation7 + $0xd0] sm:$0xff]  }
 0x39e   : > { %1642 = vmatpush3.bf16.xpose.msra.mxu0 %v849_v12  ;;  %v1818_v12 = vld [vmem:[#allocation7 + $0xd8] sm:$0xff]  }
 0x39f   : > { %1653 = vmatprep.subr.bf16.mxu0 %v2053_v0 }
 0x3a3   : > { %v1834_v14 = vpop.eup %1833 }
 0x3a4   : > { %v685_v15 = vmul.f32 %v1834_v14, %v1832_v5  ;;  %v1820_v14 = vld [vmem:[#allocation7 + $0xe8] sm:$0xff]  }
 0x3a5   : > { %1644 = vmatmul.mubr.msk.bf16.vlgmr.msra.gmra.mrb[8].mxu0 %vm627_vm1, %v842_v10  ;;  %v1816_v10 = vld [vmem:[#allocation7 + $0xc8] sm:$0xff]  }
 0x3a6   : > { %1654 = vmatpush3.bf16.xpose.msra.mxu0 %v957_v16  ;;  %v686_v17 = vpack.c.bf16 %v685_v15, %v685_v15  ;;  %1655 = vmatprep.mubr.msk.bf16.mxu0 %vm2054_vm0, %v2053_v0  ;;  %v1821_v15 = vld [vmem:[#allocation7 + $0xf0] sm:$0xff]  }
 0x3a7   : > { %1665 = vmatprep.subr.bf16.mxu0 %v2053_v0 }
 0x3a8   : > { %1626 = vmatmul.mubr.msk.bf16.vlgmr.msra.gmra.mrb[8].mxu1 %vm674_vm2, %v686_v17 }
 0x3a9   : > { %1630 = vmatpush3.bf16.xpose.msra.mxu1 %v740_v18  ;;  %1631 = vmatprep.mubr.msk.bf16.mxu1 %vm2054_vm0, %v2053_v0 }
 0x3aa   : > { %1635 = vmatprep.subr.bf16.mxu1 %v2053_v0 }
 0x3ad   : > { %1656 = vmatmul.mubr.msk.bf16.vlgmr.msra.gmra.mrb[12].mxu0 %vm627_vm1, %v950_v20 }
 0x3ae   : > { %1681 = vmatprep.mubr.msk.bf16.mxu0 %vm2054_vm0, %v2053_v0  ;;  %1666 = vmatpush3.bf16.msra.mxu0 %v1815_v9  ;;  %v1195_v9 = vsub.s32 4, %v2330_v23 }
 0x3af   : > { %1667 = vmatprep.subr.bf16.mxu0 %v2053_v0 }
 0x3b0   : > { %1632 = vmatmul.mubr.msk.bf16.vlgmr.msra.gmra.mrb[12].mxu1 %vm627_vm1, %v732_v8 }
 0x3b1   : > { %1637 = vmatprep.mubr.msk.bf16.mxu1 %vm2054_vm0, %v2053_v0 }
 0x3b2   : > { %1668 = vmatpush3.bf16.msra.mxu0 %v1816_v10  ;;  %v1196_v10 = vrot.slane %v2334_v26, %v1195_v9 }
 0x3b3   : > { %1669 = vmatprep.subr.bf16.mxu0 %v2053_v0 }
 0x3b6   : > { %1670 = vmatpush3.bf16.msra.mxu0 %v1817_v11 }
 0x3b7   : > { %1671 = vmatprep.subr.bf16.mxu0 %v2053_v0 }
 0x3ba   : > { %1672 = vmatpush3.bf16.msra.mxu0 %v1818_v12 }
 0x3bb   : > { %1673 = vmatprep.subr.bf16.mxu0 %v2053_v0 }
 0x3be   : > { %1674 = vmatpush3.bf16.msra.mxu0 %v1819_v13 }
 0x3bf   : > { %1675 = vmatprep.subr.bf16.mxu0 %v2053_v0 }
 0x3c2   : > { %1676 = vmatpush3.bf16.msra.mxu0 %v1820_v14 }
 0x3c3   : > { %1677 = vmatprep.subr.bf16.mxu0 %v2053_v0 }
 0x3c6   : > { %1678 = vmatpush3.bf16.msra.mxu0 %v1821_v15 }
 0x3c7   : > { %1679 = vmatprep.subr.bf16.mxu0 %v2053_v0 }
 0x478   : > { %v885_v21 = vpop.f32.mrb[8].mxu0 }
 0x479   : > { %v1645_v22 = vpop.f32.mrb[9].mxu0  ;;  %v891_v24 = vsel %vm674_vm2, %v885_v21, -inf }
 0x47a   : > { %892 = vmax.xlane.f32.xlu0 %v891_v24  ;;  %v888_v25 = vpop.f32.mrb[10].mxu0 }
 0x47b   : > { %v2393_v27 = vpop.f32.mrb[8].mxu1  ;;  %v1646_v28 = vpop.f32.mrb[11].mxu0 }
 0x47c   : > { %v1627_v29 = vpop.f32.mrb[9].mxu1 }
 0x47d   : > { %v727_v30 = vpop.f32.mrb[10].mxu1 }
 0x47e   : > { %v1628_v31 = vpop.f32.mrb[11].mxu1 }
 0x480   : > { %v993_v32 = vpop.f32.mrb[12].mxu0 }
 0x481   : > { %v1657_v33 = vpop.f32.mrb[13].mxu0  ;;  %v999_v41 = vsel %vm674_vm2, %v993_v32, -inf }
 0x482   : > { %v996_v34 = vpop.f32.mrb[14].mxu0 }
 0x483   : > { %v776_v35 = vpop.f32.mrb[12].mxu1  ;;  %v1658_v36 = vpop.f32.mrb[15].mxu0 }
 0x484   : > { %v1633_v37 = vpop.f32.mrb[13].mxu1  ;;  %v782_v38 = vsel %vm674_vm2, %v776_v35, -inf }
 0x485   : > { %783 = vmax.xlane.f32.xlu1 %v782_v38  ;;  %v779_v39 = vpop.f32.mrb[14].mxu1 }
 0x486   : > { %v1634_v40 = vpop.f32.mrb[15].mxu1 }
 0x487   : > { %v1077_v40 = vsub.s32 3, %v2330_v23 }
 0x489   : > { %1000 = vmax.xlane.f32.xlu1 %v999_v41  ;;  %v1078_v41 = vrot.slane %v2334_v26, %v1077_v40 }
 0x507   : > { %v893_v42 = vpop.xlane.xlu0 %892 }
 0x508   : > { %v894_v43 = vsub.f32 %v885_v21, %v893_v42  ;;  %v1822_v21 = vld [vmem:[#allocation7 + $0xf8] sm:$0xff]  }
 0x509   : > { %1680 = vmatpush3.bf16.msra.mxu0 %v1822_v21 }
 0x50a   : > { %v895_v44 = vmul.f32 1.442695, %v894_v43 }
 0x50c   : > { %1835 = vpow2.f32 %v895_v44 }
 0x512   : > { %v784_v45 = vpop.xlane.xlu1 %783 }
 0x513   : > { %v785_v46 = vsub.f32 %v776_v35, %v784_v45 }
 0x515   : > { %v786_v51 = vmul.f32 1.442695, %v785_v46 }
 0x516   : > { %v1836_v47 = vpop.eup %1835  ;;  %v1001_v48 = vpop.xlane.xlu1 %1000 }
 0x517   : > { %v1002_v49 = vsub.f32 %v993_v32, %v1001_v48  ;;  %v897_v50 = vsel %vm674_vm2, %v1836_v47, 0.0  ;;  %v1823_v48 = vld [vmem:[#allocation7 + $0x100] sm:$0xff]  }
 0x518   : > { %898 = vadd.xlane.f32.xlu0 %v897_v50 }
 0x519   : > { %v1003_v52 = vmul.f32 1.442695, %v1002_v49 }
 0x51b   : > { %1837 = vpow2.f32 %v1003_v52 }
 0x51c   : > { %1839 = vpow2.f32 %v786_v51 }
 0x525   : > { %v1838_v53 = vpop.eup %1837 }
 0x526   : > { %v1005_v54 = vsel %vm674_vm2, %v1838_v53, 0.0  ;;  %v1840_v55 = vpop.eup %1839 }
 0x527   : > { %1006 = vadd.xlane.f32.xlu1 %v1005_v54  ;;  %v788_v56 = vsel %vm674_vm2, %v1840_v55, 0.0  ;;  %v1826_v54 = vld [vmem:[#allocation7 + $0x118] sm:$0xff]  }
 0x52b   : > { %789 = vadd.xlane.f32.xlu1 %v788_v56  ;;  %v1829_v56 = vld [vmem:[#allocation7 + $0x130] sm:$0xff]  }
 0x52e   : > { %795 = vrot.lane.b32.xlu0 %v2367_v1, %s2055_s0 }
 0x53c   : > { %903 = vrot.lane.b32.xlu1 %v2367_v1, %s2056_s26 }
 0x540   : > { %1011 = vrot.lane.b32.xlu1 %v2367_v1, %s2057_s29 }
 0x5a5   : > { %v899_v57 = vpop.xlane.xlu0 %898 }
 0x5a9   : > { %v796_v58 = vpop.permute.xlu0 %795 }
 0x5aa   : > { %1636 = vmatpush3.bf16.msra.mxu1 %v796_v58 }
 0x5ab   : > { %1647 = vmatprep.subr.bf16.mxu1 %v2053_v0 }
 0x5b4   : > { %v1007_v59 = vpop.xlane.xlu1 %1006 }
 0x5b8   : > { %v790_v60 = vpop.xlane.xlu1 %789 }
 0x5b9   : > { %1841 = vrcp.f32 %v790_v60 }
 0x5ba   : > { %1843 = vrcp.f32 %v899_v57  ;;  %v1830_v57 = vld [vmem:[#allocation7 + $0x138] sm:$0xff]  }
 0x5bb   : > { %1845 = vrcp.f32 %v1007_v59 }
 0x5bc   : > { %v904_v3 = vpop.permute.xlu1 %903 }
 0x5c0   : > { %v1012_v6 = vpop.permute.xlu1 %1011 }
 0x5c3   : > { %v1842_v61 = vpop.eup %1841 }
 0x5c4   : > { %v792_v62 = vmul.f32 %v1842_v61, %v1840_v55  ;;  %v1844_v2 = vpop.eup %1843  ;;  %v1828_v55 = vld [vmem:[#allocation7 + $0x128] sm:$0xff]  }
 0x5c5   : > { %v901_v1 = vmul.f32 %v1844_v2, %v1836_v47  ;;  %v1846_v5 = vpop.eup %1845  ;;  %v1184_v2 = vsub.s32 5, %v2330_v23 }
 0x5c6   : > { %v793_v63 = vpack.c.bf16 %v792_v62, %v792_v62  ;;  %v1009_v7 = vmul.f32 %v1846_v5, %v1838_v53  ;;  %v1825_v53 = vld [vmem:[#allocation7 + $0x110] sm:$0xff]  }
 0x5c7   : > { %v902_v4 = vpack.c.bf16 %v901_v1, %v901_v1  ;;  %v1185_v1 = vrot.slane %v2334_v26, %v1184_v2 }
 0x5c8   : > { %1638 = vmatmul.mubr.msk.bf16.vlgmr.msra.gmra.mrb[16].mxu1 %vm674_vm2, %v793_v63  ;;  %v1010_v8 = vpack.c.bf16 %v1009_v7, %v1009_v7 }
 0x5c9   : > { %1648 = vmatpush3.bf16.msra.mxu1 %v904_v3  ;;  %1649 = vmatprep.mubr.msk.bf16.mxu1 %vm2054_vm0, %v2053_v0  ;;  %v1189_v3 = vsub.s32 6, %v2330_v23 }
 0x5ca   : > { %1659 = vmatprep.subr.bf16.mxu1 %v2053_v0 }
 0x5d0   : > { %1650 = vmatmul.mubr.msk.bf16.vlgmr.msra.gmra.mrb[20].mxu1 %vm674_vm2, %v902_v4 }
 0x5d1   : > { %1660 = vmatpush3.bf16.msra.mxu1 %v1012_v6  ;;  %1661 = vmatprep.mubr.msk.bf16.mxu1 %vm2054_vm0, %v2053_v0  ;;  %v1190_v6 = vrot.slane %v2334_v26, %v1189_v3 }
 0x5d2   : > { %1685 = vmatprep.subr.bf16.mxu1 %v2053_v0 }
 0x5d8   : > { %1662 = vmatmul.mubr.msk.bf16.vlgmr.msra.gmra.mrb[24].mxu1 %vm674_vm2, %v1010_v8 }
 0x5d9   : > { %1701 = vmatprep.mubr.msk.bf16.mxu1 %vm2054_vm0, %v2053_v0  ;;  %1686 = vmatpush3.bf16.msra.mxu1 %v1823_v48 }
 0x5da   : > { %1687 = vmatprep.subr.bf16.mxu1 %v2053_v0 }
 0x69b   : > { %v835_v16 = vpop.f32.mrb[16].mxu1 }
 0x69c   : > { %1058 = vrot.lane.b32.xlu0 %v835_v16, %s2057_s29  ;;  %v1639_v17 = vpop.f32.mrb[17].mxu1 }
 0x69d   : > { %v838_v18 = vpop.f32.mrb[18].mxu1 }
 0x69e   : > { %v1640_v20 = vpop.f32.mrb[19].mxu1 }
 0x6a3   : > { %v943_v22 = vpop.f32.mrb[20].mxu1 }
 0x6a4   : > { %1062 = vrot.lane.b32.xlu1 %v943_v22, %s2056_s26  ;;  %v1651_v24 = vpop.f32.mrb[21].mxu1 }
 0x6a5   : > { %v946_v25 = vpop.f32.mrb[22].mxu1 }
 0x6a6   : > { %v1652_v28 = vpop.f32.mrb[23].mxu1 }
 0x6ab   : > { %v1051_v29 = vpop.f32.mrb[24].mxu1 }
 0x6ac   : > { %1066 = vrot.lane.b32.xlu0 %v1051_v29, %s2055_s0  ;;  %v1663_v30 = vpop.f32.mrb[25].mxu1 }
 0x6ad   : > { %v1054_v31 = vpop.f32.mrb[26].mxu1 }
 0x6ae   : > { %v1664_v32 = vpop.f32.mrb[27].mxu1 }
 0x6af   : > { %v1303_v32 = vsub.s32 7, %v2330_v23 }
 0x70e   : > { %v1059_v33 = vpop.permute.xlu0 %1058 }
 0x70f   : > { %v1069_v35 = vsel %vm627_vm1, %v2393_v27, %v1059_v33  ;;  %v1824_v27 = vld [vmem:[#allocation7 + $0x108] sm:$0xff]   ;;  %v1304_v33 = vrot.slane %v2334_v26, %v1303_v32 }
 0x710   : > { %1688 = vmatpush3.bf16.msra.mxu1 %v1824_v27 }
 0x711   : > { %1689 = vmatprep.subr.bf16.mxu1 %v2053_v0 }
 0x714   : > { %1690 = vmatpush3.bf16.msra.mxu1 %v1825_v53 }
 0x715   : > { %1691 = vmatprep.subr.bf16.mxu1 %v2053_v0 }
 0x716   : > { %v1063_v34 = vpop.permute.xlu1 %1062 }
 0x717   : > { %v1071_v36 = vsel %vm1070_vm3, %v1069_v35, %v1063_v34 }
 0x718   : > { %1692 = vmatpush3.bf16.msra.mxu1 %v1826_v54 }
 0x719   : > { %1693 = vmatprep.subr.bf16.mxu1 %v2053_v0 }
 0x71e   : > { %v1067_v37 = vpop.permute.xlu0 %1066 }
 0x71f   : > { %v1073_v38 = vsel %vm1072_vm4, %v1071_v36, %v1067_v37  ;;  %v1490_v36 = vld [vmem:[#allocation8 + $0x8] ss:$0 sm:$0xff] }
 0x720   : > { %v1074_v39 = vpack.c.bf16 %v1073_v38, %v1073_v38 }
 0x722   : > { %1682 = vmatmul.mubr.bf16.vlgmr.msra.gmra.mrb[16].mxu0 %v1074_v39 }
 0x7f5   : > { %v1161_v42 = vpop.f32.mrb[16].mxu0 }
 0x7f6   : > { %v1162_v43 = vadd.f32 %v1161_v42, %v1078_v41  ;;  %v1683_v44 = vpop.f32.mrb[17].mxu0 }
 0x7f7   : > { %v1164_v45 = vpop.f32.mrb[18].mxu0 }
 0x7f8   : > { %v1684_v46 = vpop.f32.mrb[19].mxu0  ;;  %v1167_v47 = vadd.f32 %v1162_v43, %v2315_v19  ;;  %v1827_v19 = vld [vmem:[#allocation7 + $0x120] sm:$0xff]  }
 0x7f9   : > { %1694 = vmatpush3.bf16.msra.mxu1 %v1827_v19 }
 0x7fa   : > { %1168 = vadd.xlane.f32.xlu1 %v1167_v47  ;;  %1695 = vmatprep.subr.bf16.mxu1 %v2053_v0 }
 0x7fd   : > { %1696 = vmatpush3.bf16.msra.mxu1 %v1828_v55 }
 0x7fe   : > { %1697 = vmatprep.subr.bf16.mxu1 %v2053_v0 }
 0x801   : > { %1698 = vmatpush3.bf16.msra.mxu1 %v1829_v56 }
 0x802   : > { %1699 = vmatprep.subr.bf16.mxu1 %v2053_v0 }
 0x805   : > { %1700 = vmatpush3.bf16.msra.mxu1 %v1830_v57 }
 0x887   : > { %v1169_v49 = vpop.xlane.xlu1 %1168 }
 0x888   : > { %v1170_v50 = vmul.f32 0.03125, %v1169_v49 }
 0x88a   : > { %v1171_v51 = vsub.f32 %v1167_v47, %v1170_v50  ;;  %v1175_v58 = vmul.f32 %v1170_v50, %v1170_v50 }
 0x88c   : > { %v1172_v52 = vmul.f32 %v1171_v51, %v1171_v51  ;;  %v1176_v59 = vmul.f32 96.0, %v1175_v58 }
 0x88e   : > { %1173 = vadd.xlane.f32.xlu0 %v1172_v52 }
 0x91b   : > { %v1174_v60 = vpop.xlane.xlu0 %1173 }
 0x91c   : > { %v1177_v61 = vsub.f32 %v1174_v60, %v1176_v59 }
 0x91e   : > { %v1178_v62 = vmul.f32 0.03125, %v1177_v61 }
 0x920   : > { %v1179_v63 = vadd.f32 1e-05, %v1178_v62 }
 0x922   : > { %1847 = vrsqrt.f32 %v1179_v63 }
 0x92c   : > { %v1848_v4 = vpop.eup %1847 }
 0x92d   : > { %v1181_v5 = vmul.f32 %v1848_v4, %v1171_v51 }
 0x92f   : > { %v1186_v7 = vmul.f32 %v1185_v1, %v1181_v5 }
 0x931   : > { %v1191_v0 = vadd.f32 %v1190_v6, %v1186_v7 }
 0x933   : > { %v1192_v8 = vpack.c.bf16 %v1191_v0, %v1191_v0 }
 0x935   : > { %1702 = vmatmul.mubr.bf16.vlgmr.msra.gmra.mrb[28].mxu1 %v1192_v8 }
 0xa08   : > { %v1279_v11 = vpop.f32.mrb[28].mxu1 }
 0xa09   : > { %v1280_v12 = vadd.f32 %v1279_v11, %v1196_v10  ;;  %v1703_v13 = vpop.f32.mrb[29].mxu1 }
 0xa0a   : > { %v1282_v14 = vpop.f32.mrb[30].mxu1 }
 0xa0b   : > { %v1285_v15 = vmax.f32 %v1280_v12, 0.0  ;;  %v1704_v16 = vpop.f32.mrb[31].mxu1 }
 0xa0d   : > { %v1286_v17 = vadd.f32 %v1285_v15, %v1191_v0 }
 0xa0f   : > { %1287 = vadd.xlane.f32.xlu0 %v1286_v17 }
 0xa9c   : > { %v1288_v18 = vpop.xlane.xlu0 %1287 }
 0xa9d   : > { %v1289_v20 = vmul.f32 0.03125, %v1288_v18 }
 0xa9f   : > { %v1290_v21 = vsub.f32 %v1286_v17, %v1289_v20  ;;  %v1294_v24 = vmul.f32 %v1289_v20, %v1289_v20 }
 0xaa1   : > { %v1291_v22 = vmul.f32 %v1290_v21, %v1290_v21  ;;  %v1295_v25 = vmul.f32 96.0, %v1294_v24 }
 0xaa3   : > { %1292 = vadd.xlane.f32.xlu1 %v1291_v22 }
 0xb30   : > { %v1293_v28 = vpop.xlane.xlu1 %1292 }
 0xb31   : > { %v1296_v29 = vsub.f32 %v1293_v28, %v1295_v25 }
 0xb33   : > { %v1297_v30 = vmul.f32 0.03125, %v1296_v29 }
 0xb35   : > { %v1298_v31 = vadd.f32 1e-05, %v1297_v30 }
 0xb37   : > { %1849 = vrsqrt.f32 %v1298_v31 }
 0xb41   : > { %v1850_v34 = vpop.eup %1849 }
 0xb42   : > { %v1300_v35 = vmul.f32 %v1850_v34, %v1290_v21 }
 0xb44   : > { %v1305_v37 = vmul.f32 %v1304_v33, %v1300_v35 }
 0xb46   : > { %v1310_v38 = vadd.f32 %v1490_v36, %v1305_v37 }
 0xb48   : > { %1311 = vst [vmem:[%s257_s25] sm:$0xff] %v1310_v38 }
 0xb49   : > { %1978 = shalt.err (!%p1975_p6)
}
 0xb4a   : > { %s1979_s12 = scalar_lea.hbm %s2453_s13, 128  ;;  %s1983_s20 = scalar_lea.hbm %s2501_s4, 256 }
 0xb4b   : > { %p1980_p13 = scmp.ne.s32.totalorder %s2453_s13, %s1979_s12  ;;  %p1984_p9 = scmp.lt.u32.totalorder %s2453_s13, %s2501_s4 }
 0xb4c   : > { %p1985_p10 = scmp.lt.u32.totalorder %s1983_s20, %s1979_s12  ;;  %p1987_p0 = scmp.lt.u32.totalorder %s1979_s12, %s2453_s13 }
 0xb4d   : > { %p1981_p8 = pnand %p1980_p13, %p2528_p7 }
 0xb4e   : > { %p1986_p1 = por %p1985_p10, %p1984_p9 }
 0xb4f   : > { %p1982_p3 = pneg %p1981_p8 }
 0xb50   : > { %p1988_p2 = por %p1987_p0, %p1986_p1 }
 0xb52   : > { %p1989_p4 = pnand %p1988_p2, %p1982_p3 }
 0xb54   : > { %1992 = shalt.err (!%p1989_p4)
}
 0xb55   : > { %1719 = dma.vmem_to_hbm [thread:$0]  (%p2528_p7), %s2455_s8, 128, %s2453_s13, %s1313_s22  }
 0xb56 PF: > { %s1338_s29 = sand.u32 1, %s2031_s15   ;;  %p2529_p11 = scmp.ne.s32.totalorder %s2511_s28, 0 }
 0xb57   : > { %p2530_p12 = scmp.ge.s32.totalorder %s2043_s18, 2  ;;  %s1339_s30 = scalar_lea.sflag [#allocation4], %s1338_s29 }
 0xb59   : > { %p1736_p5 = pnand %p2530_p12, %p2529_p11 }
 0xb5b   : > { %2026 = dma.done.wait (!%p1736_p5), %s1339_s30, 128  }
 0xb5c   : > { %2028 = vsyncadd (!%p1736_p5), %s1339_s30, 4294967168  ;;  %p19_p6 = scmp.ge.s32.totalorder %s2109_s21, 4   ;;  %s2531_s15 = smov %s2035_s16 }
 0xb5d   : > { %s2532_s16 = smov %s2039_s17  ;;  %s2533_s17 = smov %s2121_s24 }
 0xb5e   : > { %s2534_s18 = smov %s2109_s21  ;;  %21 = sbr.rel (!%p19_p6) target bundleno = 9 (0x9), region = 94 }
 0xb65   :  { %1344 = vsyncpa [#allocation3], 1 }
 0xb66   :  { %1346 = vsyncpa [#allocation3 + $0x1], 1 }
 0xb67   :  { %1347 = vsyncpa [#allocation6], 1 }
 0xb68   :  { %1349 = vsyncpa [#allocation6 + $0x1], 1 }
 0xb69   :  { %1350 = vsyncpa [#allocation9], 1 }
 0xb6a   :  { %1351 = vsyncpa [#allocation4], 1 }
 0xb6b   :  { %1353 = vsyncpa [#allocation4 + $0x1], 1 }

</bundles_post_ra>
